<compile_context>
chip_gen: v7x
topology: tpu7x:2x2x1
jax: 0.10.0
libtpu: 0.0.40
codegen_flags: <defaults>
</compile_context>

<pallas_src>
import functools

import jax
import jax.numpy as jnp
from jax.experimental import pallas as pl
from jax.experimental.pallas import tpu as pltpu


# ------------------------- fused conv->conv->BN kernel ------------------------- #
def fused_conv_conv_bn_kernel(x_ref, w_ref, b_ref, g_ref, bt_ref, o_ref,
                              im1_ref, im2_ref,
                              *, W, KH, KW, OH2, OW2, L1, L2, cnt, eps):
    # x_ref  : (N, Cin, H*W)        flattened NCHW input (row stride W)
    # w_ref  : (Cout, KH*KW*Cin)    lane-dense im2col weights (shared by both convs)
    # b_ref  : (Cout, 1)            conv bias
    # g_ref  : (Cout, 1)            BN gamma
    # bt_ref : (Cout, 1)            BN beta
    # o_ref  : (N, Cout, OH2*OW2)   compacted, normalized conv2 output (lane-dense)
    # im1_ref: VMEM (KH*KW*Cin, L1) im2col scratch for conv1
    # im2_ref: VMEM (KH*KW*Cin, L2) im2col scratch for conv2
    N = x_ref.shape[0]
    Cin = x_ref.shape[1]
    Cout = o_ref.shape[1]
    f32 = jnp.float32

    w2d = w_ref[...].astype(f32)        # (Cout, KH*KW*Cin)  ~2 vregs
    bias = b_ref[...].astype(f32)       # (Cout, 1)
    gamma = g_ref[...].astype(f32)      # (Cout, 1)
    beta = bt_ref[...].astype(f32)      # (Cout, 1)

    ys = []
    s1 = jnp.zeros((Cout, 1), f32)
    s2 = jnp.zeros((Cout, 1), f32)
    for n in range(N):
        xn = x_ref[n].astype(f32)       # (Cin, H*W)

        # ---- conv1: each lane shift done exactly once into the im2col scratch ----
        for kh in range(KH):
            for kw in range(KW):
                t = kh * KW + kw
                s = kh * W + kw
                im1_ref[t * Cin:(t + 1) * Cin, :] = xn[:, s:s + L1]
        acc1 = jnp.dot(w2d, im1_ref[...], preferred_element_type=f32) + bias  # (Cout, L1)

        # ---- conv2: runs directly on conv1's stride-W flattened output; its valid
        #      windows only ever read valid conv1 columns (shape-checked in wrapper). ----
        for kh in range(KH):
            for kw in range(KW):
                t = kh * KW + kw
                s = kh * W + kw
                im2_ref[t * Cout:(t + 1) * Cout, :] = acc1[:, s:s + L2]
        acc2 = jnp.dot(w2d, im2_ref[...], preferred_element_type=f32) + bias  # (Cout, L2)

        # ---- in-kernel compaction: drop wrap-around columns -> lane-dense (Cout, OH2*OW2) ----
        yc = jnp.concatenate(
            [acc2[:, oh * W: oh * W + OW2] for oh in range(OH2)], axis=1)
        ys.append(yc)
        # single-pass BN statistics (valid elements only, no mask needed)
        s1 = s1 + jnp.sum(yc, axis=1, keepdims=True)
        s2 = s2 + jnp.sum(yc * yc, axis=1, keepdims=True)

    # ---- BatchNorm (training mode): biased batch statistics per channel ----
    mean = s1 * (1.0 / cnt)                              # (Cout, 1)
    var = s2 * (1.0 / cnt) - mean * mean                 # biased variance
    scale = jax.lax.rsqrt(var + eps) * gamma             # (Cout, 1)
    shift = beta - mean * scale                          # (Cout, 1)

    for n in range(N):
        o_ref[n, :, :] = (ys[n] * scale + shift).astype(o_ref.dtype)


# ----------------------------------- wrapper ----------------------------------- #
def model_forward(x_nchw, w_oihw, bias, gamma, beta, eps=1e-5):
    N, Cin, H, W = x_nchw.shape
    Cout, Cin2, KH, KW = w_oihw.shape
    assert Cin2 == Cin and Cout == Cin  # shared conv applied twice
    OH1, OW1 = H - KH + 1, W - KW + 1
    OH2, OW2 = OH1 - KH + 1, OW1 - KW + 1
    L1 = (OH1 - 1) * W + OW1       # stride-W flattened conv1 output length
    L2 = (OH2 - 1) * W + OW2       # stride-W flattened conv2 output length

    # shape-coupling guards for the stride-W implicit-im2col trick
    assert OW2 + KW - 1 <= OW1, "conv2 windows would read wrap-around conv1 columns"
    assert L2 + (KH - 1) * W + (KW - 1) <= L1, "conv2 im2col would read past conv1 output"
    assert L1 + (KH - 1) * W + (KW - 1) <= H * W, "conv1 im2col would read past the input"

    x_flat = x_nchw.reshape(N, Cin, H * W)
    # lane-dense im2col weights: column index (kh*KW + kw)*Cin + cin
    w2d = jnp.transpose(w_oihw, (0, 2, 3, 1)).reshape(Cout, KH * KW * Cin)
    b2 = bias.reshape(Cout, 1)
    g2 = gamma.reshape(Cout, 1)
    bt2 = beta.reshape(Cout, 1)

    kernel = functools.partial(
        fused_conv_conv_bn_kernel, W=W, KH=KH, KW=KW, OH2=OH2, OW2=OW2,
        L1=L1, L2=L2, cnt=float(N * OH2 * OW2), eps=eps)

    out_flat = pl.pallas_call(
        kernel,
        out_shape=jax.ShapeDtypeStruct((N, Cout, OH2 * OW2), x_nchw.dtype),
        scratch_shapes=[pltpu.VMEM((KH * KW * Cin, L1), jnp.float32),
                        pltpu.VMEM((KH * KW * Cin, L2), jnp.float32)],
    )(x_flat, w2d, b2, g2, bt2)

    # output is already compacted in-kernel: this reshape is free (no pad / crop)
    return out_flat.reshape(N, Cout, OH2, OW2)


# ---------------------------------- reference ----------------------------------- #
def reference(x_nchw, w_oihw, b, gamma, beta, eps=1e-5):
    dn = ('NCHW', 'OIHW', 'NCHW')
    y = jax.lax.conv_general_dilated(x_nchw, w_oihw, (1, 1), 'VALID',
                                     dimension_numbers=dn) + b.reshape(1, -1, 1, 1)
    y = jax.lax.conv_general_dilated(y, w_oihw, (1, 1), 'VALID',
                                     dimension_numbers=dn) + b.reshape(1, -1, 1, 1)
    mean = jnp.mean(y, axis=(0, 2, 3), keepdims=True)
    var = jnp.var(y, axis=(0, 2, 3), keepdims=True)
    return ((y - mean) * jax.lax.rsqrt(var + eps)
            * gamma.reshape(1, -1, 1, 1) + beta.reshape(1, -1, 1, 1))


# ------------------------------------- main -------------------------------------- #
if __name__ == "__main__":
    key = jax.random.PRNGKey(0)
    kx, kw, kb = jax.random.split(key, 3)

    # Shapes match the module: x = torch.randn(1, 8, 32, 32), Conv2d(8, 8, 5) twice.
    N, Cin, H, W = 1, 8, 32, 32
    Cout, KH, KW = 8, 5, 5

    x = jax.random.normal(kx, (N, Cin, H, W), jnp.float32)
    w = jax.random.normal(kw, (Cout, Cin, KH, KW), jnp.float32) * 0.1
    b = jax.random.normal(kb, (Cout,), jnp.float32) * 0.1
    gamma = jnp.ones((Cout,), jnp.float32)    # BatchNorm affine defaults
    beta = jnp.zeros((Cout,), jnp.float32)

    out = jax.jit(model_forward)(x, w, b, gamma, beta)
    out = jax.block_until_ready(out)

    ref = reference(x, w, b, gamma, beta)
    assert out.shape == (N, Cout, H - 2 * (KH - 1), W - 2 * (KW - 1))
    err = float(jnp.max(jnp.abs(out - ref)))
    if not bool(jnp.allclose(out, ref, atol=2e-4, rtol=2e-4)):
        raise AssertionError(f"mismatch vs reference, max abs err = {err}")
    print("KERNEL_OK")
</pallas_src>

<mosaic_0001>
module attributes {stable_mosaic.version = 11 : i64} {
  func.func @fused_conv_conv_bn_kernel(%arg0: memref<1x8x1024xf32, #tpu.memory_space<vmem>>, %arg1: memref<8x200xf32, #tpu.memory_space<vmem>>, %arg2: memref<8x1xf32, #tpu.memory_space<vmem>>, %arg3: memref<8x1xf32, #tpu.memory_space<vmem>>, %arg4: memref<8x1xf32, #tpu.memory_space<vmem>>, %arg5: memref<1x8x576xf32, #tpu.memory_space<vmem>>, %arg6: memref<200x892xf32, #tpu.memory_space<vmem>>, %arg7: memref<200x760xf32, #tpu.memory_space<vmem>>) attributes {dimension_semantics = [], scalar_prefetch = 0 : i64, scratch_operands = 2 : i64, tpu.core_type = #tpu.core_type<tc>} {
    %c0 = arith.constant 0 : index
    %c0_0 = arith.constant 0 : index
    %0 = vector.load %arg1[%c0, %c0_0] : memref<8x200xf32, #tpu.memory_space<vmem>>, vector<8x200xf32>
    %c0_1 = arith.constant 0 : index
    %c0_2 = arith.constant 0 : index
    %1 = vector.load %arg2[%c0_1, %c0_2] : memref<8x1xf32, #tpu.memory_space<vmem>>, vector<8x1xf32>
    %c0_3 = arith.constant 0 : index
    %c0_4 = arith.constant 0 : index
    %2 = vector.load %arg3[%c0_3, %c0_4] : memref<8x1xf32, #tpu.memory_space<vmem>>, vector<8x1xf32>
    %c0_5 = arith.constant 0 : index
    %c0_6 = arith.constant 0 : index
    %3 = vector.load %arg4[%c0_5, %c0_6] : memref<8x1xf32, #tpu.memory_space<vmem>>, vector<8x1xf32>
    %cst = arith.constant 0.000000e+00 : f32
    %4 = vector.broadcast %cst : f32 to vector<8x1xf32>
    %cst_7 = arith.constant 0.000000e+00 : f32
    %5 = vector.broadcast %cst_7 : f32 to vector<8x1xf32>
    %c0_8 = arith.constant 0 : index
    %c0_9 = arith.constant 0 : index
    %c0_10 = arith.constant 0 : index
    %6 = vector.load %arg0[%c0_8, %c0_9, %c0_10] : memref<1x8x1024xf32, #tpu.memory_space<vmem>>, vector<1x8x1024xf32>
    %7 = vector.shape_cast %6 : vector<1x8x1024xf32> to vector<8x1024xf32>
    %8 = vector.extract_strided_slice %7 {offsets = [0, 0], sizes = [8, 892], strides = [1, 1]} : vector<8x1024xf32> to vector<8x892xf32>
    %c0_11 = arith.constant 0 : index
    %c0_12 = arith.constant 0 : index
    %9 = vector.load %arg6[%c0_11, %c0_12] : memref<200x892xf32, #tpu.memory_space<vmem>>, vector<8x892xf32>
    tpu.vector_store %arg6[%c0_11, %c0_12], %8 {strides = array<i32>} : memref<200x892xf32, #tpu.memory_space<vmem>>, vector<8x892xf32>,
    %10 = vector.extract_strided_slice %7 {offsets = [0, 1], sizes = [8, 892], strides = [1, 1]} : vector<8x1024xf32> to vector<8x892xf32>
    %c8 = arith.constant 8 : index
    %c0_13 = arith.constant 0 : index
    %11 = vector.load %arg6[%c8, %c0_13] : memref<200x892xf32, #tpu.memory_space<vmem>>, vector<8x892xf32>
    tpu.vector_store %arg6[%c8, %c0_13], %10 {strides = array<i32>} : memref<200x892xf32, #tpu.memory_space<vmem>>, vector<8x892xf32>,
    %12 = vector.extract_strided_slice %7 {offsets = [0, 2], sizes = [8, 892], strides = [1, 1]} : vector<8x1024xf32> to vector<8x892xf32>
    %c16 = arith.constant 16 : index
    %c0_14 = arith.constant 0 : index
    %13 = vector.load %arg6[%c16, %c0_14] : memref<200x892xf32, #tpu.memory_space<vmem>>, vector<8x892xf32>
    tpu.vector_store %arg6[%c16, %c0_14], %12 {strides = array<i32>} : memref<200x892xf32, #tpu.memory_space<vmem>>, vector<8x892xf32>,
    %14 = vector.extract_strided_slice %7 {offsets = [0, 3], sizes = [8, 892], strides = [1, 1]} : vector<8x1024xf32> to vector<8x892xf32>
    %c24 = arith.constant 24 : index
    %c0_15 = arith.constant 0 : index
    %15 = vector.load %arg6[%c24, %c0_15] : memref<200x892xf32, #tpu.memory_space<vmem>>, vector<8x892xf32>
    tpu.vector_store %arg6[%c24, %c0_15], %14 {strides = array<i32>} : memref<200x892xf32, #tpu.memory_space<vmem>>, vector<8x892xf32>,
    %16 = vector.extract_strided_slice %7 {offsets = [0, 4], sizes = [8, 892], strides = [1, 1]} : vector<8x1024xf32> to vector<8x892xf32>
    %c32 = arith.constant 32 : index
    %c0_16 = arith.constant 0 : index
    %17 = vector.load %arg6[%c32, %c0_16] : memref<200x892xf32, #tpu.memory_space<vmem>>, vector<8x892xf32>
    tpu.vector_store %arg6[%c32, %c0_16], %16 {strides = array<i32>} : memref<200x892xf32, #tpu.memory_space<vmem>>, vector<8x892xf32>,
    %18 = vector.extract_strided_slice %7 {offsets = [0, 32], sizes = [8, 892], strides = [1, 1]} : vector<8x1024xf32> to vector<8x892xf32>
    %c40 = arith.constant 40 : index
    %c0_17 = arith.constant 0 : index
    %19 = vector.load %arg6[%c40, %c0_17] : memref<200x892xf32, #tpu.memory_space<vmem>>, vector<8x892xf32>
    tpu.vector_store %arg6[%c40, %c0_17], %18 {strides = array<i32>} : memref<200x892xf32, #tpu.memory_space<vmem>>, vector<8x892xf32>,
    %20 = vector.extract_strided_slice %7 {offsets = [0, 33], sizes = [8, 892], strides = [1, 1]} : vector<8x1024xf32> to vector<8x892xf32>
    %c48 = arith.constant 48 : index
    %c0_18 = arith.constant 0 : index
    %21 = vector.load %arg6[%c48, %c0_18] : memref<200x892xf32, #tpu.memory_space<vmem>>, vector<8x892xf32>
    tpu.vector_store %arg6[%c48, %c0_18], %20 {strides = array<i32>} : memref<200x892xf32, #tpu.memory_space<vmem>>, vector<8x892xf32>,
    %22 = vector.extract_strided_slice %7 {offsets = [0, 34], sizes = [8, 892], strides = [1, 1]} : vector<8x1024xf32> to vector<8x892xf32>
    %c56 = arith.constant 56 : index
    %c0_19 = arith.constant 0 : index
    %23 = vector.load %arg6[%c56, %c0_19] : memref<200x892xf32, #tpu.memory_space<vmem>>, vector<8x892xf32>
    tpu.vector_store %arg6[%c56, %c0_19], %22 {strides = array<i32>} : memref<200x892xf32, #tpu.memory_space<vmem>>, vector<8x892xf32>,
    %24 = vector.extract_strided_slice %7 {offsets = [0, 35], sizes = [8, 892], strides = [1, 1]} : vector<8x1024xf32> to vector<8x892xf32>
    %c64 = arith.constant 64 : index
    %c0_20 = arith.constant 0 : index
    %25 = vector.load %arg6[%c64, %c0_20] : memref<200x892xf32, #tpu.memory_space<vmem>>, vector<8x892xf32>
    tpu.vector_store %arg6[%c64, %c0_20], %24 {strides = array<i32>} : memref<200x892xf32, #tpu.memory_space<vmem>>, vector<8x892xf32>,
    %26 = vector.extract_strided_slice %7 {offsets = [0, 36], sizes = [8, 892], strides = [1, 1]} : vector<8x1024xf32> to vector<8x892xf32>
    %c72 = arith.constant 72 : index
    %c0_21 = arith.constant 0 : index
    %27 = vector.load %arg6[%c72, %c0_21] : memref<200x892xf32, #tpu.memory_space<vmem>>, vector<8x892xf32>
    tpu.vector_store %arg6[%c72, %c0_21], %26 {strides = array<i32>} : memref<200x892xf32, #tpu.memory_space<vmem>>, vector<8x892xf32>,
    %28 = vector.extract_strided_slice %7 {offsets = [0, 64], sizes = [8, 892], strides = [1, 1]} : vector<8x1024xf32> to vector<8x892xf32>
    %c80 = arith.constant 80 : index
    %c0_22 = arith.constant 0 : index
    %29 = vector.load %arg6[%c80, %c0_22] : memref<200x892xf32, #tpu.memory_space<vmem>>, vector<8x892xf32>
    tpu.vector_store %arg6[%c80, %c0_22], %28 {strides = array<i32>} : memref<200x892xf32, #tpu.memory_space<vmem>>, vector<8x892xf32>,
    %30 = vector.extract_strided_slice %7 {offsets = [0, 65], sizes = [8, 892], strides = [1, 1]} : vector<8x1024xf32> to vector<8x892xf32>
    %c88 = arith.constant 88 : index
    %c0_23 = arith.constant 0 : index
    %31 = vector.load %arg6[%c88, %c0_23] : memref<200x892xf32, #tpu.memory_space<vmem>>, vector<8x892xf32>
    tpu.vector_store %arg6[%c88, %c0_23], %30 {strides = array<i32>} : memref<200x892xf32, #tpu.memory_space<vmem>>, vector<8x892xf32>,
    %32 = vector.extract_strided_slice %7 {offsets = [0, 66], sizes = [8, 892], strides = [1, 1]} : vector<8x1024xf32> to vector<8x892xf32>
    %c96 = arith.constant 96 : index
    %c0_24 = arith.constant 0 : index
    %33 = vector.load %arg6[%c96, %c0_24] : memref<200x892xf32, #tpu.memory_space<vmem>>, vector<8x892xf32>
    tpu.vector_store %arg6[%c96, %c0_24], %32 {strides = array<i32>} : memref<200x892xf32, #tpu.memory_space<vmem>>, vector<8x892xf32>,
    %34 = vector.extract_strided_slice %7 {offsets = [0, 67], sizes = [8, 892], strides = [1, 1]} : vector<8x1024xf32> to vector<8x892xf32>
    %c104 = arith.constant 104 : index
    %c0_25 = arith.constant 0 : index
    %35 = vector.load %arg6[%c104, %c0_25] : memref<200x892xf32, #tpu.memory_space<vmem>>, vector<8x892xf32>
    tpu.vector_store %arg6[%c104, %c0_25], %34 {strides = array<i32>} : memref<200x892xf32, #tpu.memory_space<vmem>>, vector<8x892xf32>,
    %36 = vector.extract_strided_slice %7 {offsets = [0, 68], sizes = [8, 892], strides = [1, 1]} : vector<8x1024xf32> to vector<8x892xf32>
    %c112 = arith.constant 112 : index
    %c0_26 = arith.constant 0 : index
    %37 = vector.load %arg6[%c112, %c0_26] : memref<200x892xf32, #tpu.memory_space<vmem>>, vector<8x892xf32>
    tpu.vector_store %arg6[%c112, %c0_26], %36 {strides = array<i32>} : memref<200x892xf32, #tpu.memory_space<vmem>>, vector<8x892xf32>,
    %38 = vector.extract_strided_slice %7 {offsets = [0, 96], sizes = [8, 892], strides = [1, 1]} : vector<8x1024xf32> to vector<8x892xf32>
    %c120 = arith.constant 120 : index
    %c0_27 = arith.constant 0 : index
    %39 = vector.load %arg6[%c120, %c0_27] : memref<200x892xf32, #tpu.memory_space<vmem>>, vector<8x892xf32>
    tpu.vector_store %arg6[%c120, %c0_27], %38 {strides = array<i32>} : memref<200x892xf32, #tpu.memory_space<vmem>>, vector<8x892xf32>,
    %40 = vector.extract_strided_slice %7 {offsets = [0, 97], sizes = [8, 892], strides = [1, 1]} : vector<8x1024xf32> to vector<8x892xf32>
    %c128 = arith.constant 128 : index
    %c0_28 = arith.constant 0 : index
    %41 = vector.load %arg6[%c128, %c0_28] : memref<200x892xf32, #tpu.memory_space<vmem>>, vector<8x892xf32>
    tpu.vector_store %arg6[%c128, %c0_28], %40 {strides = array<i32>} : memref<200x892xf32, #tpu.memory_space<vmem>>, vector<8x892xf32>,
    %42 = vector.extract_strided_slice %7 {offsets = [0, 98], sizes = [8, 892], strides = [1, 1]} : vector<8x1024xf32> to vector<8x892xf32>
    %c136 = arith.constant 136 : index
    %c0_29 = arith.constant 0 : index
    %43 = vector.load %arg6[%c136, %c0_29] : memref<200x892xf32, #tpu.memory_space<vmem>>, vector<8x892xf32>
    tpu.vector_store %arg6[%c136, %c0_29], %42 {strides = array<i32>} : memref<200x892xf32, #tpu.memory_space<vmem>>, vector<8x892xf32>,
    %44 = vector.extract_strided_slice %7 {offsets = [0, 99], sizes = [8, 892], strides = [1, 1]} : vector<8x1024xf32> to vector<8x892xf32>
    %c144 = arith.constant 144 : index
    %c0_30 = arith.constant 0 : index
    %45 = vector.load %arg6[%c144, %c0_30] : memref<200x892xf32, #tpu.memory_space<vmem>>, vector<8x892xf32>
    tpu.vector_store %arg6[%c144, %c0_30], %44 {strides = array<i32>} : memref<200x892xf32, #tpu.memory_space<vmem>>, vector<8x892xf32>,
    %46 = vector.extract_strided_slice %7 {offsets = [0, 100], sizes = [8, 892], strides = [1, 1]} : vector<8x1024xf32> to vector<8x892xf32>
    %c152 = arith.constant 152 : index
    %c0_31 = arith.constant 0 : index
    %47 = vector.load %arg6[%c152, %c0_31] : memref<200x892xf32, #tpu.memory_space<vmem>>, vector<8x892xf32>
    tpu.vector_store %arg6[%c152, %c0_31], %46 {strides = array<i32>} : memref<200x892xf32, #tpu.memory_space<vmem>>, vector<8x892xf32>,
    %48 = vector.extract_strided_slice %7 {offsets = [0, 128], sizes = [8, 892], strides = [1, 1]} : vector<8x1024xf32> to vector<8x892xf32>
    %c160 = arith.constant 160 : index
    %c0_32 = arith.constant 0 : index
    %49 = vector.load %arg6[%c160, %c0_32] : memref<200x892xf32, #tpu.memory_space<vmem>>, vector<8x892xf32>
    tpu.vector_store %arg6[%c160, %c0_32], %48 {strides = array<i32>} : memref<200x892xf32, #tpu.memory_space<vmem>>, vector<8x892xf32>,
    %50 = vector.extract_strided_slice %7 {offsets = [0, 129], sizes = [8, 892], strides = [1, 1]} : vector<8x1024xf32> to vector<8x892xf32>
    %c168 = arith.constant 168 : index
    %c0_33 = arith.constant 0 : index
    %51 = vector.load %arg6[%c168, %c0_33] : memref<200x892xf32, #tpu.memory_space<vmem>>, vector<8x892xf32>
    tpu.vector_store %arg6[%c168, %c0_33], %50 {strides = array<i32>} : memref<200x892xf32, #tpu.memory_space<vmem>>, vector<8x892xf32>,
    %52 = vector.extract_strided_slice %7 {offsets = [0, 130], sizes = [8, 892], strides = [1, 1]} : vector<8x1024xf32> to vector<8x892xf32>
    %c176 = arith.constant 176 : index
    %c0_34 = arith.constant 0 : index
    %53 = vector.load %arg6[%c176, %c0_34] : memref<200x892xf32, #tpu.memory_space<vmem>>, vector<8x892xf32>
    tpu.vector_store %arg6[%c176, %c0_34], %52 {strides = array<i32>} : memref<200x892xf32, #tpu.memory_space<vmem>>, vector<8x892xf32>,
    %54 = vector.extract_strided_slice %7 {offsets = [0, 131], sizes = [8, 892], strides = [1, 1]} : vector<8x1024xf32> to vector<8x892xf32>
    %c184 = arith.constant 184 : index
    %c0_35 = arith.constant 0 : index
    %55 = vector.load %arg6[%c184, %c0_35] : memref<200x892xf32, #tpu.memory_space<vmem>>, vector<8x892xf32>
    tpu.vector_store %arg6[%c184, %c0_35], %54 {strides = array<i32>} : memref<200x892xf32, #tpu.memory_space<vmem>>, vector<8x892xf32>,
    %56 = vector.extract_strided_slice %7 {offsets = [0, 132], sizes = [8, 892], strides = [1, 1]} : vector<8x1024xf32> to vector<8x892xf32>
    %c192 = arith.constant 192 : index
    %c0_36 = arith.constant 0 : index
    %57 = vector.load %arg6[%c192, %c0_36] : memref<200x892xf32, #tpu.memory_space<vmem>>, vector<8x892xf32>
    tpu.vector_store %arg6[%c192, %c0_36], %56 {strides = array<i32>} : memref<200x892xf32, #tpu.memory_space<vmem>>, vector<8x892xf32>,
    %c0_37 = arith.constant 0 : index
    %c0_38 = arith.constant 0 : index
    %58 = vector.load %arg6[%c0_37, %c0_38] : memref<200x892xf32, #tpu.memory_space<vmem>>, vector<200x892xf32>
    %cst_39 = arith.constant dense<0.000000e+00> : vector<8x892xf32>
    %59 = tpu.matmul %0, %58, %cst_39 {dimension_numbers = #tpu.dot_dimension_numbers<[1], [0], [0], [1], [0, 0, 1, 1], [], []>} : vector<8x200xf32>, vector<200x892xf32>, vector<8x892xf32> -> vector<8x892xf32>
    %60 = vector.broadcast %1 : vector<8x1xf32> to vector<8x892xf32>
    %61 = arith.addf %59, %60 : vector<8x892xf32>
    %62 = vector.extract_strided_slice %61 {offsets = [0, 0], sizes = [8, 760], strides = [1, 1]} : vector<8x892xf32> to vector<8x760xf32>
    %c0_40 = arith.constant 0 : index
    %c0_41 = arith.constant 0 : index
    %63 = vector.load %arg7[%c0_40, %c0_41] : memref<200x760xf32, #tpu.memory_space<vmem>>, vector<8x760xf32>
    tpu.vector_store %arg7[%c0_40, %c0_41], %62 {strides = array<i32>} : memref<200x760xf32, #tpu.memory_space<vmem>>, vector<8x760xf32>,
    %64 = vector.extract_strided_slice %61 {offsets = [0, 1], sizes = [8, 760], strides = [1, 1]} : vector<8x892xf32> to vector<8x760xf32>
    %c8_42 = arith.constant 8 : index
    %c0_43 = arith.constant 0 : index
    %65 = vector.load %arg7[%c8_42, %c0_43] : memref<200x760xf32, #tpu.memory_space<vmem>>, vector<8x760xf32>
    tpu.vector_store %arg7[%c8_42, %c0_43], %64 {strides = array<i32>} : memref<200x760xf32, #tpu.memory_space<vmem>>, vector<8x760xf32>,
    %66 = vector.extract_strided_slice %61 {offsets = [0, 2], sizes = [8, 760], strides = [1, 1]} : vector<8x892xf32> to vector<8x760xf32>
    %c16_44 = arith.constant 16 : index
    %c0_45 = arith.constant 0 : index
    %67 = vector.load %arg7[%c16_44, %c0_45] : memref<200x760xf32, #tpu.memory_space<vmem>>, vector<8x760xf32>
    tpu.vector_store %arg7[%c16_44, %c0_45], %66 {strides = array<i32>} : memref<200x760xf32, #tpu.memory_space<vmem>>, vector<8x760xf32>,
    %68 = vector.extract_strided_slice %61 {offsets = [0, 3], sizes = [8, 760], strides = [1, 1]} : vector<8x892xf32> to vector<8x760xf32>
    %c24_46 = arith.constant 24 : index
    %c0_47 = arith.constant 0 : index
    %69 = vector.load %arg7[%c24_46, %c0_47] : memref<200x760xf32, #tpu.memory_space<vmem>>, vector<8x760xf32>
    tpu.vector_store %arg7[%c24_46, %c0_47], %68 {strides = array<i32>} : memref<200x760xf32, #tpu.memory_space<vmem>>, vector<8x760xf32>,
    %70 = vector.extract_strided_slice %61 {offsets = [0, 4], sizes = [8, 760], strides = [1, 1]} : vector<8x892xf32> to vector<8x760xf32>
    %c32_48 = arith.constant 32 : index
    %c0_49 = arith.constant 0 : index
    %71 = vector.load %arg7[%c32_48, %c0_49] : memref<200x760xf32, #tpu.memory_space<vmem>>, vector<8x760xf32>
    tpu.vector_store %arg7[%c32_48, %c0_49], %70 {strides = array<i32>} : memref<200x760xf32, #tpu.memory_space<vmem>>, vector<8x760xf32>,
    %72 = vector.extract_strided_slice %61 {offsets = [0, 32], sizes = [8, 760], strides = [1, 1]} : vector<8x892xf32> to vector<8x760xf32>
    %c40_50 = arith.constant 40 : index
    %c0_51 = arith.constant 0 : index
    %73 = vector.load %arg7[%c40_50, %c0_51] : memref<200x760xf32, #tpu.memory_space<vmem>>, vector<8x760xf32>
    tpu.vector_store %arg7[%c40_50, %c0_51], %72 {strides = array<i32>} : memref<200x760xf32, #tpu.memory_space<vmem>>, vector<8x760xf32>,
    %74 = vector.extract_strided_slice %61 {offsets = [0, 33], sizes = [8, 760], strides = [1, 1]} : vector<8x892xf32> to vector<8x760xf32>
    %c48_52 = arith.constant 48 : index
    %c0_53 = arith.constant 0 : index
    %75 = vector.load %arg7[%c48_52, %c0_53] : memref<200x760xf32, #tpu.memory_space<vmem>>, vector<8x760xf32>
    tpu.vector_store %arg7[%c48_52, %c0_53], %74 {strides = array<i32>} : memref<200x760xf32, #tpu.memory_space<vmem>>, vector<8x760xf32>,
    %76 = vector.extract_strided_slice %61 {offsets = [0, 34], sizes = [8, 760], strides = [1, 1]} : vector<8x892xf32> to vector<8x760xf32>
    %c56_54 = arith.constant 56 : index
    %c0_55 = arith.constant 0 : index
    %77 = vector.load %arg7[%c56_54, %c0_55] : memref<200x760xf32, #tpu.memory_space<vmem>>, vector<8x760xf32>
    tpu.vector_store %arg7[%c56_54, %c0_55], %76 {strides = array<i32>} : memref<200x760xf32, #tpu.memory_space<vmem>>, vector<8x760xf32>,
    %78 = vector.extract_strided_slice %61 {offsets = [0, 35], sizes = [8, 760], strides = [1, 1]} : vector<8x892xf32> to vector<8x760xf32>
    %c64_56 = arith.constant 64 : index
    %c0_57 = arith.constant 0 : index
    %79 = vector.load %arg7[%c64_56, %c0_57] : memref<200x760xf32, #tpu.memory_space<vmem>>, vector<8x760xf32>
    tpu.vector_store %arg7[%c64_56, %c0_57], %78 {strides = array<i32>} : memref<200x760xf32, #tpu.memory_space<vmem>>, vector<8x760xf32>,
    %80 = vector.extract_strided_slice %61 {offsets = [0, 36], sizes = [8, 760], strides = [1, 1]} : vector<8x892xf32> to vector<8x760xf32>
    %c72_58 = arith.constant 72 : index
    %c0_59 = arith.constant 0 : index
    %81 = vector.load %arg7[%c72_58, %c0_59] : memref<200x760xf32, #tpu.memory_space<vmem>>, vector<8x760xf32>
    tpu.vector_store %arg7[%c72_58, %c0_59], %80 {strides = array<i32>} : memref<200x760xf32, #tpu.memory_space<vmem>>, vector<8x760xf32>,
    %82 = vector.extract_strided_slice %61 {offsets = [0, 64], sizes = [8, 760], strides = [1, 1]} : vector<8x892xf32> to vector<8x760xf32>
    %c80_60 = arith.constant 80 : index
    %c0_61 = arith.constant 0 : index
    %83 = vector.load %arg7[%c80_60, %c0_61] : memref<200x760xf32, #tpu.memory_space<vmem>>, vector<8x760xf32>
    tpu.vector_store %arg7[%c80_60, %c0_61], %82 {strides = array<i32>} : memref<200x760xf32, #tpu.memory_space<vmem>>, vector<8x760xf32>,
    %84 = vector.extract_strided_slice %61 {offsets = [0, 65], sizes = [8, 760], strides = [1, 1]} : vector<8x892xf32> to vector<8x760xf32>
    %c88_62 = arith.constant 88 : index
    %c0_63 = arith.constant 0 : index
    %85 = vector.load %arg7[%c88_62, %c0_63] : memref<200x760xf32, #tpu.memory_space<vmem>>, vector<8x760xf32>
    tpu.vector_store %arg7[%c88_62, %c0_63], %84 {strides = array<i32>} : memref<200x760xf32, #tpu.memory_space<vmem>>, vector<8x760xf32>,
    %86 = vector.extract_strided_slice %61 {offsets = [0, 66], sizes = [8, 760], strides = [1, 1]} : vector<8x892xf32> to vector<8x760xf32>
    %c96_64 = arith.constant 96 : index
    %c0_65 = arith.constant 0 : index
    %87 = vector.load %arg7[%c96_64, %c0_65] : memref<200x760xf32, #tpu.memory_space<vmem>>, vector<8x760xf32>
    tpu.vector_store %arg7[%c96_64, %c0_65], %86 {strides = array<i32>} : memref<200x760xf32, #tpu.memory_space<vmem>>, vector<8x760xf32>,
    %88 = vector.extract_strided_slice %61 {offsets = [0, 67], sizes = [8, 760], strides = [1, 1]} : vector<8x892xf32> to vector<8x760xf32>
    %c104_66 = arith.constant 104 : index
    %c0_67 = arith.constant 0 : index
    %89 = vector.load %arg7[%c104_66, %c0_67] : memref<200x760xf32, #tpu.memory_space<vmem>>, vector<8x760xf32>
    tpu.vector_store %arg7[%c104_66, %c0_67], %88 {strides = array<i32>} : memref<200x760xf32, #tpu.memory_space<vmem>>, vector<8x760xf32>,
    %90 = vector.extract_strided_slice %61 {offsets = [0, 68], sizes = [8, 760], strides = [1, 1]} : vector<8x892xf32> to vector<8x760xf32>
    %c112_68 = arith.constant 112 : index
    %c0_69 = arith.constant 0 : index
    %91 = vector.load %arg7[%c112_68, %c0_69] : memref<200x760xf32, #tpu.memory_space<vmem>>, vector<8x760xf32>
    tpu.vector_store %arg7[%c112_68, %c0_69], %90 {strides = array<i32>} : memref<200x760xf32, #tpu.memory_space<vmem>>, vector<8x760xf32>,
    %92 = vector.extract_strided_slice %61 {offsets = [0, 96], sizes = [8, 760], strides = [1, 1]} : vector<8x892xf32> to vector<8x760xf32>
    %c120_70 = arith.constant 120 : index
    %c0_71 = arith.constant 0 : index
    %93 = vector.load %arg7[%c120_70, %c0_71] : memref<200x760xf32, #tpu.memory_space<vmem>>, vector<8x760xf32>
    tpu.vector_store %arg7[%c120_70, %c0_71], %92 {strides = array<i32>} : memref<200x760xf32, #tpu.memory_space<vmem>>, vector<8x760xf32>,
    %94 = vector.extract_strided_slice %61 {offsets = [0, 97], sizes = [8, 760], strides = [1, 1]} : vector<8x892xf32> to vector<8x760xf32>
    %c128_72 = arith.constant 128 : index
    %c0_73 = arith.constant 0 : index
    %95 = vector.load %arg7[%c128_72, %c0_73] : memref<200x760xf32, #tpu.memory_space<vmem>>, vector<8x760xf32>
    tpu.vector_store %arg7[%c128_72, %c0_73], %94 {strides = array<i32>} : memref<200x760xf32, #tpu.memory_space<vmem>>, vector<8x760xf32>,
    %96 = vector.extract_strided_slice %61 {offsets = [0, 98], sizes = [8, 760], strides = [1, 1]} : vector<8x892xf32> to vector<8x760xf32>
    %c136_74 = arith.constant 136 : index
    %c0_75 = arith.constant 0 : index
    %97 = vector.load %arg7[%c136_74, %c0_75] : memref<200x760xf32, #tpu.memory_space<vmem>>, vector<8x760xf32>
    tpu.vector_store %arg7[%c136_74, %c0_75], %96 {strides = array<i32>} : memref<200x760xf32, #tpu.memory_space<vmem>>, vector<8x760xf32>,
    %98 = vector.extract_strided_slice %61 {offsets = [0, 99], sizes = [8, 760], strides = [1, 1]} : vector<8x892xf32> to vector<8x760xf32>
    %c144_76 = arith.constant 144 : index
    %c0_77 = arith.constant 0 : index
    %99 = vector.load %arg7[%c144_76, %c0_77] : memref<200x760xf32, #tpu.memory_space<vmem>>, vector<8x760xf32>
    tpu.vector_store %arg7[%c144_76, %c0_77], %98 {strides = array<i32>} : memref<200x760xf32, #tpu.memory_space<vmem>>, vector<8x760xf32>,
    %100 = vector.extract_strided_slice %61 {offsets = [0, 100], sizes = [8, 760], strides = [1, 1]} : vector<8x892xf32> to vector<8x760xf32>
    %c152_78 = arith.constant 152 : index
    %c0_79 = arith.constant 0 : index
    %101 = vector.load %arg7[%c152_78, %c0_79] : memref<200x760xf32, #tpu.memory_space<vmem>>, vector<8x760xf32>
    tpu.vector_store %arg7[%c152_78, %c0_79], %100 {strides = array<i32>} : memref<200x760xf32, #tpu.memory_space<vmem>>, vector<8x760xf32>,
    %102 = vector.extract_strided_slice %61 {offsets = [0, 128], sizes = [8, 760], strides = [1, 1]} : vector<8x892xf32> to vector<8x760xf32>
    %c160_80 = arith.constant 160 : index
    %c0_81 = arith.constant 0 : index
    %103 = vector.load %arg7[%c160_80, %c0_81] : memref<200x760xf32, #tpu.memory_space<vmem>>, vector<8x760xf32>
    tpu.vector_store %arg7[%c160_80, %c0_81], %102 {strides = array<i32>} : memref<200x760xf32, #tpu.memory_space<vmem>>, vector<8x760xf32>,
    %104 = vector.extract_strided_slice %61 {offsets = [0, 129], sizes = [8, 760], strides = [1, 1]} : vector<8x892xf32> to vector<8x760xf32>
    %c168_82 = arith.constant 168 : index
    %c0_83 = arith.constant 0 : index
    %105 = vector.load %arg7[%c168_82, %c0_83] : memref<200x760xf32, #tpu.memory_space<vmem>>, vector<8x760xf32>
    tpu.vector_store %arg7[%c168_82, %c0_83], %104 {strides = array<i32>} : memref<200x760xf32, #tpu.memory_space<vmem>>, vector<8x760xf32>,
    %106 = vector.extract_strided_slice %61 {offsets = [0, 130], sizes = [8, 760], strides = [1, 1]} : vector<8x892xf32> to vector<8x760xf32>
    %c176_84 = arith.constant 176 : index
    %c0_85 = arith.constant 0 : index
    %107 = vector.load %arg7[%c176_84, %c0_85] : memref<200x760xf32, #tpu.memory_space<vmem>>, vector<8x760xf32>
    tpu.vector_store %arg7[%c176_84, %c0_85], %106 {strides = array<i32>} : memref<200x760xf32, #tpu.memory_space<vmem>>, vector<8x760xf32>,
    %108 = vector.extract_strided_slice %61 {offsets = [0, 131], sizes = [8, 760], strides = [1, 1]} : vector<8x892xf32> to vector<8x760xf32>
    %c184_86 = arith.constant 184 : index
    %c0_87 = arith.constant 0 : index
    %109 = vector.load %arg7[%c184_86, %c0_87] : memref<200x760xf32, #tpu.memory_space<vmem>>, vector<8x760xf32>
    tpu.vector_store %arg7[%c184_86, %c0_87], %108 {strides = array<i32>} : memref<200x760xf32, #tpu.memory_space<vmem>>, vector<8x760xf32>,
    %110 = vector.extract_strided_slice %61 {offsets = [0, 132], sizes = [8, 760], strides = [1, 1]} : vector<8x892xf32> to vector<8x760xf32>
    %c192_88 = arith.constant 192 : index
    %c0_89 = arith.constant 0 : index
    %111 = vector.load %arg7[%c192_88, %c0_89] : memref<200x760xf32, #tpu.memory_space<vmem>>, vector<8x760xf32>
    tpu.vector_store %arg7[%c192_88, %c0_89], %110 {strides = array<i32>} : memref<200x760xf32, #tpu.memory_space<vmem>>, vector<8x760xf32>,
    %c0_90 = arith.constant 0 : index
    %c0_91 = arith.constant 0 : index
    %112 = vector.load %arg7[%c0_90, %c0_91] : memref<200x760xf32, #tpu.memory_space<vmem>>, vector<200x760xf32>
    %cst_92 = arith.constant dense<0.000000e+00> : vector<8x760xf32>
    %113 = tpu.matmul %0, %112, %cst_92 {dimension_numbers = #tpu.dot_dimension_numbers<[1], [0], [0], [1], [0, 0, 1, 1], [], []>} : vector<8x200xf32>, vector<200x760xf32>, vector<8x760xf32> -> vector<8x760xf32>
    %114 = vector.broadcast %1 : vector<8x1xf32> to vector<8x760xf32>
    %115 = arith.addf %113, %114 : vector<8x760xf32>
    %116 = vector.extract_strided_slice %115 {offsets = [0, 0], sizes = [8, 24], strides = [1, 1]} : vector<8x760xf32> to vector<8x24xf32>
    %117 = vector.extract_strided_slice %115 {offsets = [0, 32], sizes = [8, 24], strides = [1, 1]} : vector<8x760xf32> to vector<8x24xf32>
    %118 = vector.extract_strided_slice %115 {offsets = [0, 64], sizes = [8, 24], strides = [1, 1]} : vector<8x760xf32> to vector<8x24xf32>
    %119 = vector.extract_strided_slice %115 {offsets = [0, 96], sizes = [8, 24], strides = [1, 1]} : vector<8x760xf32> to vector<8x24xf32>
    %120 = vector.extract_strided_slice %115 {offsets = [0, 128], sizes = [8, 24], strides = [1, 1]} : vector<8x760xf32> to vector<8x24xf32>
    %121 = vector.extract_strided_slice %115 {offsets = [0, 160], sizes = [8, 24], strides = [1, 1]} : vector<8x760xf32> to vector<8x24xf32>
    %122 = vector.extract_strided_slice %115 {offsets = [0, 192], sizes = [8, 24], strides = [1, 1]} : vector<8x760xf32> to vector<8x24xf32>
    %123 = vector.extract_strided_slice %115 {offsets = [0, 224], sizes = [8, 24], strides = [1, 1]} : vector<8x760xf32> to vector<8x24xf32>
    %124 = vector.extract_strided_slice %115 {offsets = [0, 256], sizes = [8, 24], strides = [1, 1]} : vector<8x760xf32> to vector<8x24xf32>
    %125 = vector.extract_strided_slice %115 {offsets = [0, 288], sizes = [8, 24], strides = [1, 1]} : vector<8x760xf32> to vector<8x24xf32>
    %126 = vector.extract_strided_slice %115 {offsets = [0, 320], sizes = [8, 24], strides = [1, 1]} : vector<8x760xf32> to vector<8x24xf32>
    %127 = vector.extract_strided_slice %115 {offsets = [0, 352], sizes = [8, 24], strides = [1, 1]} : vector<8x760xf32> to vector<8x24xf32>
    %128 = vector.extract_strided_slice %115 {offsets = [0, 384], sizes = [8, 24], strides = [1, 1]} : vector<8x760xf32> to vector<8x24xf32>
    %129 = vector.extract_strided_slice %115 {offsets = [0, 416], sizes = [8, 24], strides = [1, 1]} : vector<8x760xf32> to vector<8x24xf32>
    %130 = vector.extract_strided_slice %115 {offsets = [0, 448], sizes = [8, 24], strides = [1, 1]} : vector<8x760xf32> to vector<8x24xf32>
    %131 = vector.extract_strided_slice %115 {offsets = [0, 480], sizes = [8, 24], strides = [1, 1]} : vector<8x760xf32> to vector<8x24xf32>
    %132 = vector.extract_strided_slice %115 {offsets = [0, 512], sizes = [8, 24], strides = [1, 1]} : vector<8x760xf32> to vector<8x24xf32>
    %133 = vector.extract_strided_slice %115 {offsets = [0, 544], sizes = [8, 24], strides = [1, 1]} : vector<8x760xf32> to vector<8x24xf32>
    %134 = vector.extract_strided_slice %115 {offsets = [0, 576], sizes = [8, 24], strides = [1, 1]} : vector<8x760xf32> to vector<8x24xf32>
    %135 = vector.extract_strided_slice %115 {offsets = [0, 608], sizes = [8, 24], strides = [1, 1]} : vector<8x760xf32> to vector<8x24xf32>
    %136 = vector.extract_strided_slice %115 {offsets = [0, 640], sizes = [8, 24], strides = [1, 1]} : vector<8x760xf32> to vector<8x24xf32>
    %137 = vector.extract_strided_slice %115 {offsets = [0, 672], sizes = [8, 24], strides = [1, 1]} : vector<8x760xf32> to vector<8x24xf32>
    %138 = vector.extract_strided_slice %115 {offsets = [0, 704], sizes = [8, 24], strides = [1, 1]} : vector<8x760xf32> to vector<8x24xf32>
    %139 = vector.extract_strided_slice %115 {offsets = [0, 736], sizes = [8, 24], strides = [1, 1]} : vector<8x760xf32> to vector<8x24xf32>
    %140 = tpu.concatenate %116, %117, %118, %119, %120, %121, %122, %123, %124, %125, %126, %127, %128, %129, %130, %131 in 1 : vector<8x24xf32>, vector<8x24xf32>, vector<8x24xf32>, vector<8x24xf32>, vector<8x24xf32>, vector<8x24xf32>, vector<8x24xf32>, vector<8x24xf32>, vector<8x24xf32>, vector<8x24xf32>, vector<8x24xf32>, vector<8x24xf32>, vector<8x24xf32>, vector<8x24xf32>, vector<8x24xf32>, vector<8x24xf32> -> vector<8x384xf32>
    %141 = tpu.concatenate %132, %133, %134, %135, %136, %137, %138, %139 in 1 : vector<8x24xf32>, vector<8x24xf32>, vector<8x24xf32>, vector<8x24xf32>, vector<8x24xf32>, vector<8x24xf32>, vector<8x24xf32>, vector<8x24xf32> -> vector<8x192xf32>
    %142 = tpu.concatenate %140, %141 in 1 : vector<8x384xf32>, vector<8x192xf32> -> vector<8x576xf32>
    %cst_93 = arith.constant dense<0.000000e+00> : vector<8xf32>
    %143 = vector.multi_reduction <add>, %142, %cst_93 [1] : vector<8x576xf32> to vector<8xf32>
    %144 = vector.shape_cast %143 : vector<8xf32> to vector<8x1xf32>
    %145 = arith.addf %4, %144 : vector<8x1xf32>
    %146 = arith.mulf %142, %142 : vector<8x576xf32>
    %cst_94 = arith.constant dense<0.000000e+00> : vector<8xf32>
    %147 = vector.multi_reduction <add>, %146, %cst_94 [1] : vector<8x576xf32> to vector<8xf32>
    %148 = vector.shape_cast %147 : vector<8xf32> to vector<8x1xf32>
    %149 = arith.addf %5, %148 : vector<8x1xf32>
    %cst_95 = arith.constant 0.00173611112 : f32
    %150 = vector.broadcast %cst_95 : f32 to vector<8x1xf32>
    %151 = arith.mulf %145, %150 : vector<8x1xf32>
    %cst_96 = arith.constant 0.00173611112 : f32
    %152 = vector.broadcast %cst_96 : f32 to vector<8x1xf32>
    %153 = arith.mulf %149, %152 : vector<8x1xf32>
    %154 = arith.mulf %151, %151 : vector<8x1xf32>
    %155 = arith.subf %153, %154 : vector<8x1xf32>
    %cst_97 = arith.constant 9.99999974E-6 : f32
    %156 = vector.broadcast %cst_97 : f32 to vector<8x1xf32>
    %157 = arith.addf %155, %156 : vector<8x1xf32>
    %158 = math.rsqrt %157 : vector<8x1xf32>
    %159 = arith.mulf %158, %2 : vector<8x1xf32>
    %160 = arith.mulf %151, %159 : vector<8x1xf32>
    %161 = arith.subf %3, %160 : vector<8x1xf32>
    %162 = vector.broadcast %159 : vector<8x1xf32> to vector<8x576xf32>
    %163 = arith.mulf %142, %162 : vector<8x576xf32>
    %164 = vector.broadcast %161 : vector<8x1xf32> to vector<8x576xf32>
    %165 = arith.addf %163, %164 : vector<8x576xf32>
    %c0_98 = arith.constant 0 : index
    %c0_99 = arith.constant 0 : index
    %c0_100 = arith.constant 0 : index
    %166 = vector.load %arg5[%c0_98, %c0_99, %c0_100] : memref<1x8x576xf32, #tpu.memory_space<vmem>>, vector<1x8x576xf32>
    %167 = vector.shape_cast %166 : vector<1x8x576xf32> to vector<8x576xf32>
    %168 = vector.shape_cast %165 : vector<8x576xf32> to vector<1x8x576xf32>
    tpu.vector_store %arg5[%c0_98, %c0_99, %c0_100], %168 {strides = array<i32>} : memref<1x8x576xf32, #tpu.memory_space<vmem>>, vector<1x8x576xf32>,
    return
  }
}

</mosaic_0001>

<bundles_post_ra>
// kernel: model_forward.1
= control target key start
LH: loop header
LB: loop body
LE: loop exit
PB: predicated region body
PF: predicated region fallthrough
CT: control target
= control target key end

     0   :  { %s2838_s24 = smov 127   ;;  %s2839_s29 = smov 126   ;;  %vm39_vm0 = vcmask 1014784   ;;  %vm62_vm1 = vcmask 1039360   ;;  %vm97_vm2 = vcmask 1031168   ;;  %vm4269_vm3 = vcmask 1022976   ;;  %s4253_s0 = inlined_call_operand.vmem [shape: f32[1,8,1024], index: 0, kind: input, shape index: {}]   ;;  %s4254_s1 = inlined_call_operand.vmem [shape: f32[8,200], index: 1, kind: input, shape index: {}]   ;;  %s4255_s2 = inlined_call_operand.vmem [shape: f32[8,1], index: 2, kind: input, shape index: {}]   ;;  %s4256_s3 = inlined_call_operand.vmem [shape: f32[8,1], index: 3, kind: input, shape index: {}]   ;;  %s4257_s4 = inlined_call_operand.vmem [shape: f32[8,1], index: 4, kind: input, shape index: {}]   ;;  %s4258_s5 = inlined_call_operand.vmem [shape: f32[1,8,576], index: 5, kind: output, shape index: {}]  }
   0x1   :  { %v2905_v0 = vld [vmem:[%s4253_s0 + $0x8] sm:$0xff]  ;;  %v2910_v1 = vld [vmem:[%s4253_s0] sm:$0xff]  ;;  %v2915_v2 = vld [vmem:[%s4253_s0 + $0x10] sm:$0xff]  ;;  %s2840_s30 = smov 125   ;;  %s2841_s6 = smov 124   ;;  %vm4268_vm4 = vcmask 785408  }
   0x2   :  { %50 = vrot.lane.b32.xlu0 %v2905_v0, %s2838_s24  ;;  %758 = vst [vmem:[#allocation2 + $0x460] sm:$0xff] %v2905_v0  ;;  %48 = vrot.lane.b32.xlu1 %v2910_v1, %s2838_s24  ;;  %759 = vst [vmem:[#allocation2 + $0x468] sm:$0xff] %v2915_v2  ;;  %v2926_v3 = vld [vmem:[%s4253_s0 + $0x18] sm:$0xff]  ;;  %v2931_v4 = vld [vmem:[%s4253_s0 + $0x20] sm:$0xff]  ;;  %s2842_s7 = smov 96   ;;  %s2843_s8 = smov 95  }
   0x3   :  { %760 = vst [vmem:[#allocation2 + $0x470] sm:$0xff] %v2926_v3  ;;  %37 = vst [vmem:[#allocation2 + $0x20] sm:$0xff] %v2931_v4  ;;  %s2844_s9 = smov 94   ;;  %v2995_v5 = vld [vmem:[%s4253_s0 + $0x28] sm:$0xff]  ;;  %v3010_v6 = vld [vmem:[%s4253_s0 + $0x30] sm:$0xff]  ;;  %s2845_s14 = smov 93  }
   0x4   :  { %761 = vst [vmem:[#allocation2 + $0x478] sm:$0xff] %v2931_v4  ;;  %38 = vst [vmem:[#allocation2 + $0x28] sm:$0xff] %v2995_v5  ;;  %s2846_s15 = smov 92   ;;  %s2847_s16 = smov 64   ;;  %v3046_v7 = vld [vmem:[%s4253_s0 + $0x38] sm:$0xff]  ;;  %vm4264_vm5 = vcmask 777216  }
   0x5   :  { %762 = vst [vmem:[#allocation2 + $0x480] sm:$0xff] %v2995_v5  ;;  %40 = vst.msk [vmem:[#allocation2 + $0x30] sm:$0xff] %vm39_vm0, %v3010_v6  ;;  %s2848_s17 = smov 63   ;;  %s2849_s0 = smov 62   ;;  %vm4263_vm6 = vcmask 769024   ;;  %vm4266_vm7 = vcmask 760832  }
   0x6   :  { %52 = vrot.lane.b32.xlu0 %v2915_v2, %s2838_s24  ;;  %54 = vrot.lane.b32.xlu1 %v2926_v3, %s2838_s24  ;;  %763 = vst [vmem:[#allocation2 + $0x488] sm:$0xff] %v3010_v6  ;;  %764 = vst.msk [vmem:[#allocation2 + $0x490] sm:$0xff] %vm39_vm0, %v3046_v7  ;;  %s2850_s20 = smov 61   ;;  %s2851_s21 = smov 60   ;;  %vm4267_vm8 = vcmask 588800   ;;  %vm4265_vm9 = vcmask 752640  }
   0x7   :  { %s2852_s22 = smov 32   ;;  %s2853_s23 = smov 31   ;;  %vm394_vm10 = vcmask 523264   ;;  %vm432_vm11 = vcmask 515072   ;;  %vm470_vm12 = vcmask 506880   ;;  %vm508_vm13 = vcmask 498688  }
   0x8   :  { %s2854_s25 = smov 30   ;;  %s2855_s26 = smov 29   ;;  %vm4259_vm14 = vcmask 490496   ;;  %vm4260_vm15 = vcmask 261120  }
   0x9   :  { %s2856_s27 = smov 28  }
   0xa   :  { %56 = vrot.lane.b32.xlu0 %v2931_v4, %s2838_s24  ;;  %85 = vrot.lane.b32.xlu1 %v2905_v0, %s2839_s29 }
   0xe   :  { %87 = vrot.lane.b32.xlu0 %v2915_v2, %s2839_s29  ;;  %120 = vrot.lane.b32.xlu1 %v2905_v0, %s2840_s30 }
  0x12   :  { %122 = vrot.lane.b32.xlu0 %v2915_v2, %s2840_s30  ;;  %83 = vrot.lane.b32.xlu1 %v2910_v1, %s2839_s29 }
  0x16   :  { %118 = vrot.lane.b32.xlu0 %v2910_v1, %s2840_s30  ;;  %89 = vrot.lane.b32.xlu1 %v2926_v3, %s2839_s29 }
  0x1a   :  { %91 = vrot.lane.b32.xlu0 %v2931_v4, %s2839_s29  ;;  %124 = vrot.lane.b32.xlu1 %v2926_v3, %s2840_s30 }
  0x1e   :  { %126 = vrot.lane.b32.xlu0 %v2931_v4, %s2840_s30  ;;  %155 = vrot.lane.b32.xlu1 %v2905_v0, %s2841_s6 }
  0x22   :  { %157 = vrot.lane.b32.xlu0 %v2915_v2, %s2841_s6  ;;  %190 = vrot.lane.b32.xlu1 %v2905_v0, %s2842_s7 }
  0x26   :  { %192 = vrot.lane.b32.xlu0 %v2915_v2, %s2842_s7  ;;  %153 = vrot.lane.b32.xlu1 %v2910_v1, %s2841_s6 }
  0x2a   :  { %188 = vrot.lane.b32.xlu0 %v2910_v1, %s2842_s7  ;;  %159 = vrot.lane.b32.xlu1 %v2926_v3, %s2841_s6 }
  0x2e   :  { %161 = vrot.lane.b32.xlu0 %v2931_v4, %s2841_s6  ;;  %194 = vrot.lane.b32.xlu1 %v2926_v3, %s2842_s7 }
  0x32   :  { %196 = vrot.lane.b32.xlu0 %v2931_v4, %s2842_s7  ;;  %228 = vrot.lane.b32.xlu1 %v2905_v0, %s2843_s8 }
  0x36   :  { %230 = vrot.lane.b32.xlu0 %v2915_v2, %s2843_s8  ;;  %266 = vrot.lane.b32.xlu1 %v2905_v0, %s2844_s9 }
  0x3a   :  { %268 = vrot.lane.b32.xlu0 %v2915_v2, %s2844_s9  ;;  %226 = vrot.lane.b32.xlu1 %v2910_v1, %s2843_s8 }
  0x3e   :  { %264 = vrot.lane.b32.xlu0 %v2910_v1, %s2844_s9  ;;  %232 = vrot.lane.b32.xlu1 %v2926_v3, %s2843_s8 }
  0x42   :  { %234 = vrot.lane.b32.xlu0 %v2931_v4, %s2843_s8  ;;  %270 = vrot.lane.b32.xlu1 %v2926_v3, %s2844_s9 }
  0x46   :  { %272 = vrot.lane.b32.xlu0 %v2931_v4, %s2844_s9  ;;  %304 = vrot.lane.b32.xlu1 %v2905_v0, %s2845_s14 }
  0x4a   :  { %306 = vrot.lane.b32.xlu0 %v2915_v2, %s2845_s14  ;;  %342 = vrot.lane.b32.xlu1 %v2905_v0, %s2846_s15 }
  0x4e   :  { %344 = vrot.lane.b32.xlu0 %v2915_v2, %s2846_s15  ;;  %302 = vrot.lane.b32.xlu1 %v2910_v1, %s2845_s14 }
  0x52   :  { %340 = vrot.lane.b32.xlu0 %v2910_v1, %s2846_s15  ;;  %308 = vrot.lane.b32.xlu1 %v2926_v3, %s2845_s14 }
  0x56   :  { %310 = vrot.lane.b32.xlu0 %v2931_v4, %s2845_s14  ;;  %346 = vrot.lane.b32.xlu1 %v2926_v3, %s2846_s15 }
  0x5a   :  { %348 = vrot.lane.b32.xlu0 %v2931_v4, %s2846_s15  ;;  %380 = vrot.lane.b32.xlu1 %v2905_v0, %s2847_s16 }
  0x5e   :  { %382 = vrot.lane.b32.xlu0 %v2915_v2, %s2847_s16  ;;  %418 = vrot.lane.b32.xlu1 %v2905_v0, %s2848_s17 }
  0x62   :  { %420 = vrot.lane.b32.xlu0 %v2915_v2, %s2848_s17  ;;  %378 = vrot.lane.b32.xlu1 %v2910_v1, %s2847_s16 }
  0x66   :  { %416 = vrot.lane.b32.xlu0 %v2910_v1, %s2848_s17  ;;  %384 = vrot.lane.b32.xlu1 %v2926_v3, %s2847_s16 }
  0x6a   :  { %386 = vrot.lane.b32.xlu0 %v2931_v4, %s2847_s16  ;;  %422 = vrot.lane.b32.xlu1 %v2926_v3, %s2848_s17 }
  0x6e   :  { %424 = vrot.lane.b32.xlu0 %v2931_v4, %s2848_s17  ;;  %456 = vrot.lane.b32.xlu1 %v2905_v0, %s2849_s0 }
  0x72   :  { %458 = vrot.lane.b32.xlu0 %v2915_v2, %s2849_s0  ;;  %494 = vrot.lane.b32.xlu1 %v2905_v0, %s2850_s20 }
  0x74   :  { %v51_v8 = vpop.permute.xlu0 %50  ;;  %v49_v9 = vpop.permute.xlu1 %48 }
  0x75   :  { %v63_v10 = vsel %vm62_vm1, %v49_v9, %v51_v8 }
  0x76   :  { %496 = vrot.lane.b32.xlu0 %v2915_v2, %s2850_s20  ;;  %454 = vrot.lane.b32.xlu1 %v2910_v1, %s2849_s0  ;;  %v2475_v16 = vpack.c.bf16 %v63_v10, %v2910_v1 }
  0x78   :  { %v53_v11 = vpop.permute.xlu0 %52  ;;  %v55_v12 = vpop.permute.xlu1 %54 }
  0x79   :  { %v64_v13 = vsel %vm62_vm1, %v51_v8, %v53_v11  ;;  %v65_v14 = vsel %vm62_vm1, %v53_v11, %v55_v12 }
  0x7a   :  { %770 = vst [vmem:[#allocation2 + $0x498] sm:$0xff] %v64_v13  ;;  %771 = vst [vmem:[#allocation2 + $0x4a0] sm:$0xff] %v65_v14  ;;  %492 = vrot.lane.b32.xlu0 %v2910_v1, %s2850_s20  ;;  %460 = vrot.lane.b32.xlu1 %v2926_v3, %s2849_s0  ;;  %v2473_v15 = vpack.c.bf16 %v64_v13, %v2905_v0  ;;  %v2523_v21 = vpack.c.bf16 %v65_v14, %v2915_v2 }
  0x7c   :  { %v3083_v17 = vpop.permute.xlu0 %56  ;;  %v86_v18 = vpop.permute.xlu1 %85  ;;  %2474 = vmatprep.subr.bf16.mxu0 %v2473_v15 }
  0x7d   :  { %v66_v19 = vsel %vm62_vm1, %v55_v12, %v3083_v17  ;;  %2476 = vmatpush1.bf16.msra.mxu0 %v2475_v16 }
  0x7e   :  { %772 = vst [vmem:[#allocation2 + $0x4a8] sm:$0xff] %v66_v19  ;;  %462 = vrot.lane.b32.xlu0 %v2931_v4, %s2849_s0  ;;  %498 = vrot.lane.b32.xlu1 %v2926_v3, %s2850_s20  ;;  %v2521_v20 = vpack.c.bf16 %v66_v19, %v2926_v3 }
  0x80   :  { %v88_v22 = vpop.permute.xlu0 %87  ;;  %v121_v23 = vpop.permute.xlu1 %120  ;;  %2522 = vmatprep.subr.bf16.mxu1 %v2521_v20 }
  0x81   :  { %v99_v24 = vsel %vm97_vm2, %v86_v18, %v88_v22  ;;  %2524 = vmatpush1.bf16.msra.mxu1 %v2523_v21 }
  0x82   :  { %782 = vst [vmem:[#allocation2 + $0x4d0] sm:$0xff] %v99_v24  ;;  %500 = vrot.lane.b32.xlu0 %v2931_v4, %s2850_s20  ;;  %532 = vrot.lane.b32.xlu1 %v2905_v0, %s2851_s21 }
  0x84   :  { %v123_v25 = vpop.permute.xlu0 %122  ;;  %v84_v26 = vpop.permute.xlu1 %83 }
  0x85   :  { %v134_v27 = vsel %vm4269_vm3, %v121_v23, %v123_v25  ;;  %v98_v28 = vsel %vm97_vm2, %v84_v26, %v86_v18 }
  0x86   :  { %794 = vst [vmem:[#allocation2 + $0x508] sm:$0xff] %v134_v27  ;;  %534 = vrot.lane.b32.xlu0 %v2915_v2, %s2851_s21  ;;  %570 = vrot.lane.b32.xlu1 %v2905_v0, %s2852_s22  ;;  %v2477_v29 = vpack.c.bf16 %v134_v27, %v99_v24 }
  0x88   :  { %v119_v30 = vpop.permute.xlu0 %118  ;;  %v90_v31 = vpop.permute.xlu1 %89  ;;  %2478 = vmatprep.subr.bf16.mxu0 %v2477_v29 }
  0x89   :  { %v133_v32 = vsel %vm4269_vm3, %v119_v30, %v121_v23  ;;  %v100_v33 = vsel %vm97_vm2, %v88_v22, %v90_v31 }
  0x8a   :  { %572 = vrot.lane.b32.xlu0 %v2915_v2, %s2852_s22  ;;  %530 = vrot.lane.b32.xlu1 %v2910_v1, %s2851_s21  ;;  %v2479_v34 = vpack.c.bf16 %v133_v32, %v98_v28 }
  0x8c   :  { %v3110_v35 = vpop.permute.xlu0 %91  ;;  %v125_v36 = vpop.permute.xlu1 %124  ;;  %2480 = vmatpush1.bf16.msra.mxu0 %v2479_v34 }
  0x8d   :  { %v101_v37 = vsel %vm97_vm2, %v90_v31, %v3110_v35  ;;  %v135_v38 = vsel %vm4269_vm3, %v123_v25, %v125_v36 }
  0x8e   :  { %784 = vst [vmem:[#allocation2 + $0x4e0] sm:$0xff] %v101_v37  ;;  %568 = vrot.lane.b32.xlu0 %v2910_v1, %s2852_s22  ;;  %536 = vrot.lane.b32.xlu1 %v2926_v3, %s2851_s21  ;;  %v3127_v43 = vpack.c.bf16 %v135_v38, %v100_v33 }
  0x90   :  { %v3119_v39 = vpop.permute.xlu0 %126  ;;  %v156_v40 = vpop.permute.xlu1 %155 }
  0x91   :  { %v136_v41 = vsel %vm4269_vm3, %v125_v36, %v3119_v39 }
  0x92   :  { %796 = vst [vmem:[#allocation2 + $0x518] sm:$0xff] %v136_v41  ;;  %538 = vrot.lane.b32.xlu0 %v2931_v4, %s2851_s21  ;;  %574 = vrot.lane.b32.xlu1 %v2926_v3, %s2852_s22  ;;  %v2525_v42 = vpack.c.bf16 %v136_v41, %v101_v37 }
  0x94   :  { %v158_v44 = vpop.permute.xlu0 %157  ;;  %v191_v45 = vpop.permute.xlu1 %190  ;;  %2526 = vmatprep.subr.bf16.mxu1 %v2525_v42 }
  0x95   :  { %v168_v46 = vsel %vm39_vm0, %v156_v40, %v158_v44  ;;  %2528 = vmatpush1.bf16.msra.mxu1 %v3127_v43 }
  0x96   :  { %806 = vst [vmem:[#allocation2 + $0x540] sm:$0xff] %v168_v46  ;;  %576 = vrot.lane.b32.xlu0 %v2931_v4, %s2852_s22  ;;  %608 = vrot.lane.b32.xlu1 %v2905_v0, %s2853_s23 }
  0x98   :  { %v193_v47 = vpop.permute.xlu0 %192  ;;  %v154_v48 = vpop.permute.xlu1 %153 }
  0x99   :  { %v206_v49 = vsel %vm4268_vm4, %v191_v45, %v193_v47  ;;  %v167_v50 = vsel %vm39_vm0, %v154_v48, %v156_v40 }
  0x9a   :  { %610 = vrot.lane.b32.xlu0 %v2915_v2, %s2853_s23  ;;  %646 = vrot.lane.b32.xlu1 %v2905_v0, %s2854_s25  ;;  %v2481_v51 = vpack.c.bf16 %v206_v49, %v168_v46 }
  0x9c   :  { %v189_v52 = vpop.permute.xlu0 %188  ;;  %v160_v53 = vpop.permute.xlu1 %159  ;;  %2482 = vmatprep.subr.bf16.mxu0 %v2481_v51 }
  0x9d   :  { %v205_v54 = vsel %vm4268_vm4, %v189_v52, %v191_v45  ;;  %v3143_v55 = vsel %vm39_vm0, %v158_v44, %v160_v53 }
  0x9e   :  { %648 = vrot.lane.b32.xlu0 %v2915_v2, %s2854_s25  ;;  %606 = vrot.lane.b32.xlu1 %v2910_v1, %s2853_s23  ;;  %v2483_v56 = vpack.c.bf16 %v205_v54, %v167_v50 }
  0xa0   :  { %v3149_v57 = vpop.permute.xlu0 %161  ;;  %v195_v58 = vpop.permute.xlu1 %194  ;;  %2484 = vmatpush1.bf16.msra.mxu0 %v2483_v56 }
  0xa1   :  { %v170_v59 = vsel %vm39_vm0, %v160_v53, %v3149_v57  ;;  %v207_v60 = vsel %vm4268_vm4, %v193_v47, %v195_v58 }
  0xa2   :  { %808 = vst [vmem:[#allocation2 + $0x550] sm:$0xff] %v170_v59  ;;  %644 = vrot.lane.b32.xlu0 %v2910_v1, %s2854_s25  ;;  %612 = vrot.lane.b32.xlu1 %v2926_v3, %s2853_s23  ;;  %v2531_v9 = vpack.c.bf16 %v207_v60, %v3143_v55 }
  0xa4   :  { %v3158_v61 = vpop.permute.xlu0 %196  ;;  %v229_v62 = vpop.permute.xlu1 %228 }
  0xa5   :  { %v208_v63 = vsel %vm4268_vm4, %v195_v58, %v3158_v61 }
  0xa6   :  { %614 = vrot.lane.b32.xlu0 %v2931_v4, %s2853_s23  ;;  %650 = vrot.lane.b32.xlu1 %v2926_v3, %s2854_s25  ;;  %v2529_v8 = vpack.c.bf16 %v208_v63, %v170_v59 }
  0xa8   :  { %v231_v10 = vpop.permute.xlu0 %230  ;;  %v267_v11 = vpop.permute.xlu1 %266  ;;  %2530 = vmatprep.subr.bf16.mxu1 %v2529_v8 }
  0xa9   :  { %v244_v12 = vsel %vm4264_vm5, %v229_v62, %v231_v10  ;;  %2532 = vmatpush1.bf16.msra.mxu1 %v2531_v9 }
  0xaa   :  { %652 = vrot.lane.b32.xlu0 %v2931_v4, %s2854_s25  ;;  %684 = vrot.lane.b32.xlu1 %v2905_v0, %s2855_s26 }
  0xac   :  { %v269_v13 = vpop.permute.xlu0 %268  ;;  %v227_v14 = vpop.permute.xlu1 %226 }
  0xad   :  { %v282_v15 = vsel %vm4263_vm6, %v267_v11, %v269_v13  ;;  %v243_v16 = vsel %vm4264_vm5, %v227_v14, %v229_v62 }
  0xae   :  { %686 = vrot.lane.b32.xlu0 %v2915_v2, %s2855_s26  ;;  %722 = vrot.lane.b32.xlu1 %v2905_v0, %s2856_s27  ;;  %v2485_v18 = vpack.c.bf16 %v282_v15, %v244_v12 }
  0xb0   :  { %v265_v19 = vpop.permute.xlu0 %264  ;;  %v233_v20 = vpop.permute.xlu1 %232  ;;  %2486 = vmatprep.subr.bf16.mxu0 %v2485_v18 }
  0xb1   :  { %v281_v21 = vsel %vm4263_vm6, %v265_v19, %v267_v11  ;;  %v245_v22 = vsel %vm4264_vm5, %v231_v10, %v233_v20 }
  0xb2   :  { %724 = vrot.lane.b32.xlu0 %v2915_v2, %s2856_s27  ;;  %682 = vrot.lane.b32.xlu1 %v2910_v1, %s2855_s26  ;;  %v2487_v23 = vpack.c.bf16 %v281_v21, %v243_v16 }
  0xb4   :  { %v3184_v24 = vpop.permute.xlu0 %234  ;;  %v271_v25 = vpop.permute.xlu1 %270  ;;  %2488 = vmatpush1.bf16.msra.mxu0 %v2487_v23 }
  0xb5   :  { %v246_v0 = vsel %vm4264_vm5, %v233_v20, %v3184_v24  ;;  %v283_v26 = vsel %vm4263_vm6, %v269_v13, %v271_v25 }
  0xb6   :  { %720 = vrot.lane.b32.xlu0 %v2910_v1, %s2856_s27  ;;  %688 = vrot.lane.b32.xlu1 %v2926_v3, %s2855_s26  ;;  %v2535_v30 = vpack.c.bf16 %v283_v26, %v245_v22  ;;  %v3204_v1 = vld [vmem:[%s4254_s1 + $0x8] sm:$0xff] }
  0xb7   :  { %2466 = vmatprep.mubr.msk.f32.mxu0 %vm4267_vm8, %v3204_v1  ;;  %2467 = vmatprep.mubr.msk.f32.mxu1 %vm4267_vm8, %v3204_v1 }
  0xb8   :  { %v3193_v2 = vpop.permute.xlu0 %272  ;;  %v305_v27 = vpop.permute.xlu1 %304 }
  0xb9   :  { %v284_v28 = vsel %vm4263_vm6, %v271_v25, %v3193_v2 }
  0xba   :  { %690 = vrot.lane.b32.xlu0 %v2931_v4, %s2855_s26  ;;  %726 = vrot.lane.b32.xlu1 %v2926_v3, %s2856_s27  ;;  %v2533_v29 = vpack.c.bf16 %v284_v28, %v246_v0 }
  0xbc   :  { %v307_v31 = vpop.permute.xlu0 %306  ;;  %v343_v32 = vpop.permute.xlu1 %342  ;;  %2534 = vmatprep.subr.bf16.mxu1 %v2533_v29 }
  0xbd   :  { %v320_v33 = vsel %vm4266_vm7, %v305_v27, %v307_v31  ;;  %2536 = vmatpush1.bf16.msra.mxu1 %v2535_v30 }
  0xbe   :  { %728 = vrot.lane.b32.xlu0 %v2931_v4, %s2856_s27  ;;  %58 = vrot.lane.b32.xlu1 %v2995_v5, %s2838_s24 }
  0xc0   :  { %v345_v3 = vpop.permute.xlu0 %344  ;;  %v303_v34 = vpop.permute.xlu1 %302 }
  0xc1   :  { %v358_v36 = vsel %vm4265_vm9, %v343_v32, %v345_v3  ;;  %v319_v37 = vsel %vm4266_vm7, %v303_v34, %v305_v27 }
  0xc2   :  { %93 = vrot.lane.b32.xlu0 %v2995_v5, %s2839_s29  ;;  %128 = vrot.lane.b32.xlu1 %v2995_v5, %s2840_s30  ;;  %v2489_v38 = vpack.c.bf16 %v358_v36, %v320_v33 }
  0xc4   :  { %v341_v40 = vpop.permute.xlu0 %340  ;;  %v309_v41 = vpop.permute.xlu1 %308  ;;  %2490 = vmatprep.subr.bf16.mxu0 %v2489_v38 }
  0xc5   :  { %v357_v4 = vsel %vm4265_vm9, %v341_v40, %v343_v32  ;;  %v321_v42 = vsel %vm4266_vm7, %v307_v31, %v309_v41 }
  0xc6   :  { %60 = vrot.lane.b32.xlu0 %v3010_v6, %s2838_s24  ;;  %163 = vrot.lane.b32.xlu1 %v2995_v5, %s2841_s6  ;;  %v2491_v44 = vpack.c.bf16 %v357_v4, %v319_v37 }
  0xc8   :  { %v3227_v45 = vpop.permute.xlu0 %310  ;;  %v347_v46 = vpop.permute.xlu1 %346  ;;  %2492 = vmatpush1.bf16.msra.mxu0 %v2491_v44 }
  0xc9   :  { %v322_v47 = vsel %vm4266_vm7, %v309_v41, %v3227_v45  ;;  %v359_v48 = vsel %vm4265_vm9, %v345_v3, %v347_v46 }
  0xca   :  { %95 = vrot.lane.b32.xlu0 %v3010_v6, %s2839_s29  ;;  %130 = vrot.lane.b32.xlu1 %v3010_v6, %s2840_s30  ;;  %v2539_v53 = vpack.c.bf16 %v359_v48, %v321_v42 }
  0xcc   :  { %v3236_v49 = vpop.permute.xlu0 %348  ;;  %v381_v50 = vpop.permute.xlu1 %380 }
  0xcd   :  { %v360_v51 = vsel %vm4265_vm9, %v347_v46, %v3236_v49 }
  0xce   :  { %165 = vrot.lane.b32.xlu0 %v3010_v6, %s2841_s6  ;;  %198 = vrot.lane.b32.xlu1 %v2995_v5, %s2842_s7  ;;  %v2537_v52 = vpack.c.bf16 %v360_v51, %v322_v47 }
  0xd0   :  { %v383_v54 = vpop.permute.xlu0 %382  ;;  %v419_v56 = vpop.permute.xlu1 %418  ;;  %2538 = vmatprep.subr.bf16.mxu1 %v2537_v52 }
  0xd1   :  { %v396_v58 = vsel %vm394_vm10, %v381_v50, %v383_v54  ;;  %2540 = vmatpush1.bf16.msra.mxu1 %v2539_v53 }
  0xd2   :  { %200 = vrot.lane.b32.xlu0 %v3010_v6, %s2842_s7  ;;  %236 = vrot.lane.b32.xlu1 %v2995_v5, %s2843_s8 }
  0xd4   :  { %v421_v59 = vpop.permute.xlu0 %420  ;;  %v379_v60 = vpop.permute.xlu1 %378 }
  0xd5   :  { %v434_v62 = vsel %vm432_vm11, %v419_v56, %v421_v59  ;;  %v395_v63 = vsel %vm394_vm10, %v379_v60, %v381_v50 }
  0xd6   :  { %238 = vrot.lane.b32.xlu0 %v3010_v6, %s2843_s8  ;;  %274 = vrot.lane.b32.xlu1 %v2995_v5, %s2844_s9  ;;  %v2493_v8 = vpack.c.bf16 %v434_v62, %v396_v58 }
  0xd8   :  { %v417_v9 = vpop.permute.xlu0 %416  ;;  %v385_v10 = vpop.permute.xlu1 %384  ;;  %2494 = vmatprep.subr.bf16.mxu0 %v2493_v8 }
  0xd9   :  { %v433_v11 = vsel %vm432_vm11, %v417_v9, %v419_v56  ;;  %v397_v12 = vsel %vm394_vm10, %v383_v54, %v385_v10 }
  0xda   :  { %276 = vrot.lane.b32.xlu0 %v3010_v6, %s2844_s9  ;;  %312 = vrot.lane.b32.xlu1 %v2995_v5, %s2845_s14  ;;  %v2495_v13 = vpack.c.bf16 %v433_v11, %v395_v63 }
  0xdc   :  { %v3261_v14 = vpop.permute.xlu0 %386  ;;  %v423_v15 = vpop.permute.xlu1 %422  ;;  %2496 = vmatpush1.bf16.msra.mxu0 %v2495_v13 }
  0xdd   :  { %v398_v16 = vsel %vm394_vm10, %v385_v10, %v3261_v14  ;;  %v435_v18 = vsel %vm432_vm11, %v421_v59, %v423_v15 }
  0xde   :  { %314 = vrot.lane.b32.xlu0 %v3010_v6, %s2845_s14  ;;  %350 = vrot.lane.b32.xlu1 %v2995_v5, %s2846_s15  ;;  %v2543_v23 = vpack.c.bf16 %v435_v18, %v397_v12 }
  0xe0   :  { %v3270_v19 = vpop.permute.xlu0 %424  ;;  %v457_v20 = vpop.permute.xlu1 %456 }
  0xe1   :  { %v436_v21 = vsel %vm432_vm11, %v423_v15, %v3270_v19 }
  0xe2   :  { %352 = vrot.lane.b32.xlu0 %v3010_v6, %s2846_s15  ;;  %202 = vrot.lane.b32.xlu1 %v3046_v7, %s2842_s7  ;;  %v2541_v22 = vpack.c.bf16 %v436_v21, %v398_v16 }
  0xe4   :  { %v459_v25 = vpop.permute.xlu0 %458  ;;  %v495_v0 = vpop.permute.xlu1 %494  ;;  %2542 = vmatprep.subr.bf16.mxu1 %v2541_v22 }
  0xe5   :  { %v472_v26 = vsel %vm470_vm12, %v457_v20, %v459_v25  ;;  %2544 = vmatpush1.bf16.msra.mxu1 %v2543_v23 }
  0xe6   :  { %388 = vrot.lane.b32.xlu0 %v2995_v5, %s2847_s16  ;;  %390 = vrot.lane.b32.xlu1 %v3010_v6, %s2847_s16 }
  0xe8   :  { %v497_v27 = vpop.permute.xlu0 %496  ;;  %v455_v28 = vpop.permute.xlu1 %454 }
  0xe9   :  { %v510_v29 = vsel %vm508_vm13, %v495_v0, %v497_v27  ;;  %v471_v30 = vsel %vm470_vm12, %v455_v28, %v457_v20  ;;  %v2857_v28 = vmov 0  }
  0xea   :  { %426 = vrot.lane.b32.xlu0 %v2995_v5, %s2848_s17  ;;  %428 = vrot.lane.b32.xlu1 %v3010_v6, %s2848_s17  ;;  %v2497_v31 = vpack.c.bf16 %v510_v29, %v472_v26 }
  0xeb   :  { %2831 = vset.pattern.permute.xlu0 %v2857_v28  ;;  %2832 = vset.pattern.permute.xlu1 %v2857_v28  ;;  %v967_v28 = vld [vmem:[#allocation2 + $0x4d0] sm:$0xff] }
  0xec   :  { %v493_v32 = vpop.permute.xlu0 %492  ;;  %v461_v33 = vpop.permute.xlu1 %460  ;;  %2498 = vmatprep.subr.bf16.mxu0 %v2497_v31 }
  0xed   :  { %v509_v3 = vsel %vm508_vm13, %v493_v32, %v495_v0  ;;  %v473_v34 = vsel %vm470_vm12, %v459_v25, %v461_v33 }
  0xee   :  { %240 = vrot.lane.b32.xlu0 %v3046_v7, %s2843_s8  ;;  %278 = vrot.lane.b32.xlu1 %v3046_v7, %s2844_s9  ;;  %v2499_v36 = vpack.c.bf16 %v509_v3, %v471_v30 }
  0xf0   :  { %v3295_v37 = vpop.permute.xlu0 %462  ;;  %v499_v38 = vpop.permute.xlu1 %498  ;;  %2500 = vmatpush1.bf16.msra.mxu0 %v2499_v36 }
  0xf1   :  { %v474_v40 = vsel %vm470_vm12, %v461_v33, %v3295_v37  ;;  %v511_v41 = vsel %vm508_vm13, %v497_v27, %v499_v38 }
  0xf2   :  { %464 = vrot.lane.b32.xlu0 %v2995_v5, %s2849_s0  ;;  %466 = vrot.lane.b32.xlu1 %v3010_v6, %s2849_s0  ;;  %v2547_v47 = vpack.c.bf16 %v511_v41, %v473_v34 }
  0xf4   :  { %v3304_v4 = vpop.permute.xlu0 %500  ;;  %v533_v42 = vpop.permute.xlu1 %532 }
  0xf5   :  { %v512_v44 = vsel %vm508_vm13, %v499_v38, %v3304_v4 }
  0xf6   :  { %502 = vrot.lane.b32.xlu0 %v2995_v5, %s2850_s20  ;;  %504 = vrot.lane.b32.xlu1 %v3010_v6, %s2850_s20  ;;  %v2545_v46 = vpack.c.bf16 %v512_v44, %v474_v40 }
  0xf8   :  { %v535_v48 = vpop.permute.xlu0 %534  ;;  %v571_v50 = vpop.permute.xlu1 %570  ;;  %2546 = vmatprep.subr.bf16.mxu1 %v2545_v46 }
  0xf9   :  { %v548_v51 = vsel %vm4259_vm14, %v533_v42, %v535_v48  ;;  %2548 = vmatpush1.bf16.msra.mxu1 %v2547_v47 }
  0xfa   :  { %316 = vrot.lane.b32.xlu0 %v3046_v7, %s2845_s14  ;;  %354 = vrot.lane.b32.xlu1 %v3046_v7, %s2846_s15 }
  0xfc   :  { %v573_v52 = vpop.permute.xlu0 %572  ;;  %v531_v53 = vpop.permute.xlu1 %530 }
  0xfd   :  { %v586_v54 = vsel %vm4260_vm15, %v571_v50, %v573_v52  ;;  %v547_v56 = vsel %vm4259_vm14, %v531_v53, %v533_v42 }
  0xfe   :  { %540 = vrot.lane.b32.xlu0 %v2995_v5, %s2851_s21  ;;  %542 = vrot.lane.b32.xlu1 %v3010_v6, %s2851_s21  ;;  %v2501_v58 = vpack.c.bf16 %v586_v54, %v548_v51 }
 0x100   :  { %v569_v59 = vpop.permute.xlu0 %568  ;;  %v537_v60 = vpop.permute.xlu1 %536  ;;  %2502 = vmatprep.subr.bf16.mxu0 %v2501_v58 }
 0x101   :  { %v585_v62 = vsel %vm4260_vm15, %v569_v59, %v571_v50  ;;  %v549_v63 = vsel %vm4259_vm14, %v535_v48, %v537_v60  ;;  %v954_v59 = vld [vmem:[#allocation2 + $0x468] sm:$0xff] }
 0x102   :  { %578 = vrot.lane.b32.xlu0 %v2995_v5, %s2852_s22  ;;  %580 = vrot.lane.b32.xlu1 %v3010_v6, %s2852_s22  ;;  %v2503_v8 = vpack.c.bf16 %v585_v62, %v547_v56 }
 0x104   :  { %v3329_v9 = vpop.permute.xlu0 %538  ;;  %v575_v10 = vpop.permute.xlu1 %574  ;;  %2504 = vmatpush1.bf16.msra.mxu0 %v2503_v8 }
 0x105   :  { %v550_v11 = vsel %vm4259_vm14, %v537_v60, %v3329_v9  ;;  %v587_v12 = vsel %vm4260_vm15, %v573_v52, %v575_v10  ;;  %vm4261_vm14 = vcmask 252928   ;;  %v961_v60 = vld [vmem:[#allocation2 + $0x4a0] sm:$0xff] }
 0x106   :  { %392 = vrot.lane.b32.xlu0 %v3046_v7, %s2847_s16  ;;  %430 = vrot.lane.b32.xlu1 %v3046_v7, %s2848_s17  ;;  %v2551_v20 = vpack.c.bf16 %v587_v12, %v549_v63  ;;  %v960_v12 = vld [vmem:[#allocation2 + $0x498] sm:$0xff] }
 0x108   :  { %v3338_v13 = vpop.permute.xlu0 %576  ;;  %v609_v15 = vpop.permute.xlu1 %608 }
 0x109   :  { %v588_v16 = vsel %vm4260_vm15, %v575_v10, %v3338_v13  ;;  %vm4262_vm15 = vcmask 244736   ;;  %v2513_v10 = vpack.c.bf16 %v961_v60, %v954_v59  ;;  %v819_v60 = vld [vmem:[#allocation2 + $0x30] sm:$0xff] }
 0x10a   :  { %616 = vrot.lane.b32.xlu0 %v2995_v5, %s2853_s23  ;;  %618 = vrot.lane.b32.xlu1 %v3010_v6, %s2853_s23  ;;  %v2549_v18 = vpack.c.bf16 %v588_v16, %v550_v11  ;;  %v953_v11 = vld [vmem:[#allocation2 + $0x460] sm:$0xff] }
 0x10c   :  { %v611_v21 = vpop.permute.xlu0 %610  ;;  %v647_v22 = vpop.permute.xlu1 %646  ;;  %2550 = vmatprep.subr.bf16.mxu1 %v2549_v18 }
 0x10d   :  { %v624_v23 = vsel %vm4261_vm14, %v609_v15, %v611_v21  ;;  %2552 = vmatpush1.bf16.msra.mxu1 %v2551_v20 }
 0x10e   :  { %654 = vrot.lane.b32.xlu0 %v2995_v5, %s2854_s25  ;;  %656 = vrot.lane.b32.xlu1 %v3010_v6, %s2854_s25 }
 0x110   :  { %v649_v25 = vpop.permute.xlu0 %648  ;;  %v607_v0 = vpop.permute.xlu1 %606 }
 0x111   :  { %v662_v26 = vsel %vm4262_vm15, %v647_v22, %v649_v25  ;;  %v623_v27 = vsel %vm4261_vm14, %v607_v0, %v609_v15 }
 0x112   :  { %468 = vrot.lane.b32.xlu0 %v3046_v7, %s2849_s0  ;;  %506 = vrot.lane.b32.xlu1 %v3046_v7, %s2850_s20  ;;  %v2505_v29 = vpack.c.bf16 %v662_v26, %v624_v23  ;;  %v22_v23 = vld [vmem:[%s4255_s2] sm:$0xff] }
 0x114   :  { %v645_v30 = vpop.permute.xlu0 %644  ;;  %v613_v31 = vpop.permute.xlu1 %612  ;;  %2506 = vmatprep.subr.bf16.mxu0 %v2505_v29 }
 0x115   :  { %v661_v32 = vsel %vm4262_vm15, %v645_v30, %v647_v22  ;;  %v625_v33 = vsel %vm4261_vm14, %v611_v21, %v613_v31  ;;  %v2515_v21 = vpack.c.bf16 %v960_v12, %v953_v11  ;;  %v974_v22 = vld [vmem:[#allocation2 + $0x508] sm:$0xff] }
 0x116   :  { %692 = vrot.lane.b32.xlu0 %v2995_v5, %s2855_s26  ;;  %694 = vrot.lane.b32.xlu1 %v3010_v6, %s2855_s26  ;;  %v2507_v3 = vpack.c.bf16 %v661_v32, %v623_v27  ;;  %v2519_v30 = vpack.c.bf16 %v974_v22, %v967_v28 }
 0x118   :  { %v3363_v34 = vpop.permute.xlu0 %614  ;;  %v651_v36 = vpop.permute.xlu1 %650  ;;  %2508 = vmatpush1.bf16.msra.mxu0 %v2507_v3 }
 0x119   :  { %v626_v38 = vsel %vm4261_vm14, %v613_v31, %v3363_v34  ;;  %v663_v40 = vsel %vm4262_vm15, %v649_v25, %v651_v36  ;;  %vm698_vm14 = vcmask 236544  }
 0x11a   :  { %730 = vrot.lane.b32.xlu0 %v2995_v5, %s2856_s27  ;;  %732 = vrot.lane.b32.xlu1 %v3010_v6, %s2856_s27  ;;  %v2555_v47 = vpack.c.bf16 %v663_v40, %v625_v33 }
 0x11c   :  { %v3372_v41 = vpop.permute.xlu0 %652  ;;  %v685_v42 = vpop.permute.xlu1 %684 }
 0x11d   :  { %v664_v44 = vsel %vm4262_vm15, %v651_v36, %v3372_v41  ;;  %vm736_vm15 = vcmask 228352   ;;  %v955_v36 = vld [vmem:[#allocation2 + $0x470] sm:$0xff] }
 0x11e   :  { %544 = vrot.lane.b32.xlu0 %v3046_v7, %s2851_s21  ;;  %582 = vrot.lane.b32.xlu1 %v3046_v7, %s2852_s22  ;;  %v2553_v46 = vpack.c.bf16 %v664_v44, %v626_v38  ;;  %v962_v38 = vld [vmem:[#allocation2 + $0x4a8] sm:$0xff] }
 0x11f   :  { %v2563_v44 = vpack.c.bf16 %v962_v38, %v955_v36 }
 0x120   :  { %v687_v48 = vpop.permute.xlu0 %686  ;;  %v723_v5 = vpop.permute.xlu1 %722  ;;  %2554 = vmatprep.subr.bf16.mxu1 %v2553_v46 }
 0x121   :  { %v700_v6 = vsel %vm698_vm14, %v685_v42, %v687_v48  ;;  %2556 = vmatpush1.bf16.msra.mxu1 %v2555_v47 }
 0x122   :  { %765 = vrot.lane.b32.xlu0 %v3046_v7, %s2838_s24  ;;  %620 = vrot.lane.b32.xlu1 %v3046_v7, %s2853_s23 }
 0x124   :  { %v725_v50 = vpop.permute.xlu0 %724  ;;  %v683_v51 = vpop.permute.xlu1 %682 }
 0x125   :  { %v738_v52 = vsel %vm736_vm15, %v723_v5, %v725_v50  ;;  %v699_v53 = vsel %vm698_vm14, %v683_v51, %v685_v42  ;;  %v981_v42 = vld [vmem:[#allocation2 + $0x540] sm:$0xff] }
 0x126   :  { %658 = vrot.lane.b32.xlu0 %v3046_v7, %s2854_s25  ;;  %777 = vrot.lane.b32.xlu1 %v3046_v7, %s2839_s29  ;;  %v2509_v54 = vpack.c.bf16 %v738_v52, %v700_v6  ;;  %v2835_v6 = vld [vmem:[#allocation2 + $0x28] sm:$0xff]  ;;  %v969_v51 = vld [vmem:[#allocation2 + $0x4e0] sm:$0xff] }
 0x128   :  { %v721_v56 = vpop.permute.xlu0 %720  ;;  %v689_v58 = vpop.permute.xlu1 %688  ;;  %2510 = vmatprep.subr.bf16.mxu0 %v2509_v54 }
 0x129   :  { %v737_v62 = vsel %vm736_vm15, %v721_v56, %v723_v5  ;;  %v701_v63 = vsel %vm698_vm14, %v687_v48, %v689_v58  ;;  %v817_v5 = vld [vmem:[#allocation2 + $0x20] sm:$0xff] }
 0x12a   :  { %789 = vrot.lane.b32.xlu0 %v3046_v7, %s2840_s30  ;;  %696 = vrot.lane.b32.xlu1 %v3046_v7, %s2855_s26  ;;  %v2511_v8 = vpack.c.bf16 %v737_v62, %v699_v53 }
 0x12c   :  { %v3397_v15 = vpop.permute.xlu0 %690  ;;  %v727_v16 = vpop.permute.xlu1 %726  ;;  %2512 = vmatpush1.bf16.msra.mxu0 %v2511_v8  ;;  %v983_v8 = vld [vmem:[#allocation2 + $0x550] sm:$0xff] }
 0x12d   :  { %v702_v18 = vsel %vm698_vm14, %v689_v58, %v3397_v15  ;;  %v739_v20 = vsel %vm736_vm15, %v725_v50, %v727_v16  ;;  %2514 = vmatprep.subr.bf16.mxu0 %v2513_v10 }
 0x12e   :  { %734 = vrot.lane.b32.xlu0 %v3046_v7, %s2856_s27  ;;  %801 = vrot.lane.b32.xlu1 %v3046_v7, %s2841_s6  ;;  %v956_v7 = vld [vmem:[#allocation2 + $0x478] sm:$0xff]  ;;  %v2559_v31 = vpack.c.bf16 %v739_v20, %v701_v63 }
 0x130   :  { %v3409_v25 = vpop.permute.xlu0 %728  ;;  %v59_v0 = vpop.permute.xlu1 %58  ;;  %2516 = vmatpush1.bf16.msra.mxu0 %v2515_v21 }
 0x131   :  { %v740_v26 = vsel %vm736_vm15, %v727_v16, %v3409_v25  ;;  %v67_v27 = vsel %vm62_vm1, %v3083_v17, %v59_v0  ;;  %2518 = vmatprep.subr.bf16.mxu0 %v3127_v43  ;;  %v3424_v43 = vld [vmem:[%s4254_s1] sm:$0xff] }
 0x132   :  { %v2557_v29 = vpack.c.bf16 %v740_v26, %v702_v18  ;;  %990 = vperm.xlu0 %2831, %v22_v23   ;;  %v2561_v3 = vpack.c.bf16 %v67_v27, %v956_v7  ;;  %v2571_v53 = vpack.c.bf16 %v67_v27, %v817_v5  ;;  %v2858_v18 = vmov 0.0|0.0  }
 0x134   :  { %v94_v32 = vpop.permute.xlu0 %93  ;;  %v129_v33 = vpop.permute.xlu1 %128  ;;  %2558 = vmatprep.subr.bf16.mxu1 %v2557_v29  ;;  %2520 = vmatpush1.bf16.msra.mxu0 %v2519_v30 }
 0x135   :  { %v102_v40 = vsel %vm97_vm2, %v3110_v35, %v94_v32  ;;  %v137_v17 = vsel %vm4269_vm3, %v3119_v39, %v129_v33  ;;  %1045 = vmatprep.subr.mxu0 %v3143_v55  ;;  %2560 = vmatpush1.bf16.msra.mxu1 %v2559_v31  ;;  %v976_v35 = vld [vmem:[#allocation2 + $0x518] sm:$0xff] }
 0x136   :  { %2562 = vmatprep.subr.bf16.mxu1 %v2561_v3  ;;  %v2565_v48 = vpack.c.bf16 %v137_v17, %v102_v40  ;;  %v2567_v52 = vpack.c.bf16 %v976_v35, %v969_v51 }
 0x138   :  { %v3426_v46 = vpop.permute.xlu0 %60  ;;  %v164_v47 = vpop.permute.xlu1 %163  ;;  %1046 = vmatpush1.msra.mxu0 %v981_v42 }
 0x139   :  { %v3430_v39 = vsel %vm62_vm1, %v59_v0, %v3426_v46  ;;  %82 = vst.msk [vmem:[#allocation2 + $0x68] sm:$0xff] %vm39_vm0, %v3426_v46  ;;  %v171_v55 = vsel %vm39_vm0, %v3149_v57, %v164_v47  ;;  %2564 = vmatpush1.bf16.msra.mxu1 %v2563_v44  ;;  %1062 = vmatmul.mubr.f32.vlgmr.msra.gmra.mrb[0].mxu0 %v3424_v43 }
 0x13a   :  { %2566 = vmatprep.subr.bf16.mxu1 %v2565_v48  ;;  %v2569_v50 = vpack.c.bf16 %v3430_v39, %v2835_v6  ;;  %2468 = vmatprep.mubr.msk.f32.mxu0 %vm4267_vm8, %v3204_v1 }
 0x13c   :  { %v3440_v54 = vpop.permute.xlu0 %95  ;;  %v3442_v56 = vpop.permute.xlu1 %130  ;;  %2570 = vmatprep.subr.bf16.mxu0 %v2569_v50 }
 0x13d   :  { %v103_v57 = vsel %vm97_vm2, %v94_v32, %v3440_v54  ;;  %117 = vst.msk [vmem:[#allocation2 + $0xa0] sm:$0xff] %vm39_vm0, %v3440_v54  ;;  %v138_v58 = vsel %vm4269_vm3, %v129_v33, %v3442_v56  ;;  %152 = vst.msk [vmem:[#allocation2 + $0xd8] sm:$0xff] %vm39_vm0, %v3442_v56  ;;  %2568 = vmatpush1.bf16.msra.mxu1 %v2567_v52  ;;  %2572 = vmatpush1.bf16.msra.mxu0 %v2571_v53 }
 0x13e   :  { %1116 = vmatprep.subr.mxu1 %v171_v55  ;;  %v3452_v59 = vpack.c.bf16 %v138_v58, %v103_v57 }
 0x140   :  { %v3454_v62 = vpop.permute.xlu0 %165  ;;  %v199_v63 = vpop.permute.xlu1 %198  ;;  %2574 = vmatprep.subr.bf16.mxu0 %v3452_v59  ;;  %v826_v10 = vld [vmem:[#allocation2 + $0x68] sm:$0xff] }
 0x141   :  { %v3459_v11 = vsel %vm39_vm0, %v164_v47, %v3454_v62  ;;  %186 = vst.msk [vmem:[#allocation2 + $0x110] sm:$0xff] %vm39_vm0, %v3454_v62  ;;  %v209_v12 = vsel %vm4268_vm4, %v3158_v61, %v199_v63  ;;  %1117 = vmatpush1.msra.mxu1 %v983_v8  ;;  %2576 = vmatpush1.bf16.msra.mxu0 %v2565_v48 }
 0x142   :  { %v2618_v16 = vpack.c.bf16 %v826_v10, %v819_v60  ;;  %1133 = vmatmul.mubr.f32.vlgmr.msra.gmra.mrb[0].mxu1 %v3424_v43  ;;  %2617 = vmatprep.subr.bf16.mxu1 %v2858_v18  ;;  %v2579_v28 = vpack.c.bf16 %v209_v12, %v171_v55 }
 0x143   :  { %2469 = vmatprep.mubr.msk.f32.mxu1 %vm4267_vm8, %v3204_v1 }
 0x144   :  { %2619 = vmatpush1.bf16.msra.mxu1 %v2618_v16  ;;  %v201_v20 = vpop.permute.xlu0 %200  ;;  %v237_v21 = vpop.permute.xlu1 %236  ;;  %v833_v22 = vld [vmem:[#allocation2 + $0xa0] sm:$0xff]  ;;  %v840_v23 = vld [vmem:[#allocation2 + $0xd8] sm:$0xff] }
 0x145   :  { %2620 = vmatprep.subr.bf16.mxu1 %v2858_v18  ;;  %v210_v61 = vsel %vm4268_vm4, %v199_v63, %v201_v20  ;;  %v247_v0 = vsel %vm4264_vm5, %v3184_v24, %v237_v21  ;;  %v2621_v26 = vpack.c.bf16 %v840_v23, %v833_v22 }
 0x146   :  { %v2577_v27 = vpack.c.bf16 %v210_v61, %v3459_v11 }
 0x148   :  { %2622 = vmatpush1.bf16.msra.mxu1 %v2621_v26  ;;  %v239_v7 = vpop.permute.xlu0 %238  ;;  %v275_v29 = vpop.permute.xlu1 %274  ;;  %2578 = vmatprep.subr.bf16.mxu0 %v2577_v27  ;;  %v847_v50 = vld [vmem:[#allocation2 + $0x110] sm:$0xff] }
 0x149   :  { %2623 = vmatprep.subr.bf16.mxu1 %v2858_v18  ;;  %v248_v1 = vsel %vm4264_vm5, %v237_v21, %v239_v7  ;;  %v285_v30 = vsel %vm4263_vm6, %v3193_v2, %v275_v29  ;;  %2580 = vmatpush1.bf16.msra.mxu0 %v2579_v28 }
 0x14a   :  { %v2583_v36 = vpack.c.bf16 %v285_v30, %v247_v0 }
 0x14c   :  { %v277_v31 = vpop.permute.xlu0 %276  ;;  %v313_v32 = vpop.permute.xlu1 %312 }
 0x14d   :  { %v286_v24 = vsel %vm4263_vm6, %v275_v29, %v277_v31  ;;  %v323_v33 = vsel %vm4266_vm7, %v3227_v45, %v313_v32 }
 0x14e   :  { %v2581_v3 = vpack.c.bf16 %v286_v24, %v248_v1 }
 0x150   :  { %v315_v38 = vpop.permute.xlu0 %314  ;;  %v351_v40 = vpop.permute.xlu1 %350  ;;  %2582 = vmatprep.subr.bf16.mxu0 %v2581_v3 }
 0x151   :  { %v324_v17 = vsel %vm4266_vm7, %v313_v32, %v315_v38  ;;  %v361_v42 = vsel %vm4265_vm9, %v3236_v49, %v351_v40  ;;  %2584 = vmatpush1.bf16.msra.mxu0 %v2583_v36 }
 0x152   :  { %v2587_v35 = vpack.c.bf16 %v361_v42, %v323_v33 }
 0x154   :  { %v353_v2 = vpop.permute.xlu0 %352  ;;  %v203_v44 = vpop.permute.xlu1 %202 }
 0x155   :  { %v362_v47 = vsel %vm4265_vm9, %v351_v40, %v353_v2  ;;  %v211_v48 = vsel %vm4268_vm4, %v201_v20, %v203_v44 }
 0x156   :  { %225 = vst.msk [vmem:[#allocation2 + $0x148] sm:$0xff] %vm39_vm0, %v211_v48  ;;  %v2585_v45 = vpack.c.bf16 %v362_v47, %v324_v17 }
 0x158   :  { %v389_v5 = vpop.permute.xlu0 %388  ;;  %v3487_v55 = vpop.permute.xlu1 %390  ;;  %2586 = vmatprep.subr.bf16.mxu0 %v2585_v45 }
 0x159   :  { %v399_v6 = vsel %vm394_vm10, %v3261_v14, %v389_v5  ;;  %v400_v49 = vsel %vm394_vm10, %v389_v5, %v3487_v55  ;;  %2588 = vmatpush1.bf16.msra.mxu0 %v2587_v35 }
 0x15c   :  { %v427_v51 = vpop.permute.xlu0 %426  ;;  %v429_v52 = vpop.permute.xlu1 %428 }
 0x15d   :  { %v437_v53 = vsel %vm432_vm11, %v3270_v19, %v427_v51  ;;  %v438_v57 = vsel %vm432_vm11, %v427_v51, %v429_v52  ;;  %v854_v58 = vld [vmem:[#allocation2 + $0x148] sm:$0xff] }
 0x15e   :  { %v2624_v60 = vpack.c.bf16 %v854_v58, %v847_v50  ;;  %v2589_v63 = vpack.c.bf16 %v438_v57, %v400_v49  ;;  %v2591_v8 = vpack.c.bf16 %v437_v53, %v399_v6 }
 0x160   :  { %v241_v10 = vpop.permute.xlu0 %240  ;;  %2625 = vmatpush1.bf16.msra.mxu1 %v2624_v60  ;;  %v279_v12 = vpop.permute.xlu1 %278  ;;  %2590 = vmatprep.subr.bf16.mxu0 %v2589_v63 }
 0x161   :  { %v249_v14 = vsel %vm4264_vm5, %v239_v7, %v241_v10  ;;  %v287_v16 = vsel %vm4263_vm6, %v277_v31, %v279_v12  ;;  %2592 = vmatpush1.bf16.msra.mxu0 %v2591_v8  ;;  %2626 = vmatprep.subr.bf16.mxu1 %v2858_v18  ;;  %vm4270_vm6 = vcmask 490496  }
 0x162   :  { %263 = vst.msk [vmem:[#allocation2 + $0x180] sm:$0xff] %vm39_vm0, %v249_v14  ;;  %301 = vst.msk [vmem:[#allocation2 + $0x1b8] sm:$0xff] %vm39_vm0, %v287_v16 }
 0x163   :  { %vm4271_vm5 = vmmov %vm4270_vm6 }
 0x164   :  { %v465_v19 = vpop.permute.xlu0 %464  ;;  %v3501_v20 = vpop.permute.xlu1 %466 }
 0x165   :  { %v475_v21 = vsel %vm470_vm12, %v3295_v37, %v465_v19  ;;  %v476_v22 = vsel %vm470_vm12, %v465_v19, %v3501_v20 }
 0x168   :  { %v503_v23 = vpop.permute.xlu0 %502  ;;  %v505_v61 = vpop.permute.xlu1 %504 }
 0x169   :  { %v513_v0 = vsel %vm508_vm13, %v3304_v4, %v503_v23  ;;  %v514_v26 = vsel %vm508_vm13, %v503_v23, %v505_v61  ;;  %v861_v27 = vld [vmem:[#allocation2 + $0x180] sm:$0xff]  ;;  %v868_v28 = vld [vmem:[#allocation2 + $0x1b8] sm:$0xff] }
 0x16a   :  { %v2627_v7 = vpack.c.bf16 %v868_v28, %v861_v27  ;;  %v2593_v29 = vpack.c.bf16 %v514_v26, %v476_v22  ;;  %v2595_v1 = vpack.c.bf16 %v513_v0, %v475_v21 }
 0x16c   :  { %v317_v30 = vpop.permute.xlu0 %316  ;;  %2628 = vmatpush1.bf16.msra.mxu1 %v2627_v7  ;;  %v355_v31 = vpop.permute.xlu1 %354  ;;  %2594 = vmatprep.subr.bf16.mxu0 %v2593_v29 }
 0x16d   :  { %v325_v37 = vsel %vm4266_vm7, %v315_v38, %v317_v30  ;;  %v363_v32 = vsel %vm4265_vm9, %v353_v2, %v355_v31  ;;  %2596 = vmatpush1.bf16.msra.mxu0 %v2595_v1  ;;  %2629 = vmatprep.subr.bf16.mxu1 %v2858_v18  ;;  %vm4272_vm9 = vcmask 261120  }
 0x16e   :  { %339 = vst.msk [vmem:[#allocation2 + $0x1f0] sm:$0xff] %vm39_vm0, %v325_v37  ;;  %377 = vst.msk [vmem:[#allocation2 + $0x228] sm:$0xff] %vm39_vm0, %v363_v32  ;;  %v957_v32 = vld [vmem:[#allocation2 + $0x480] sm:$0xff] }
 0x16f   :  { %vm4273_vm7 = vmmov %vm4272_vm9 }
 0x170   :  { %v541_v4 = vpop.permute.xlu0 %540  ;;  %v3515_v24 = vpop.permute.xlu1 %542 }
 0x171   :  { %v551_v33 = vsel %vm4270_vm6, %v3329_v9, %v541_v4  ;;  %v552_v3 = vsel %vm4271_vm5, %v541_v4, %v3515_v24  ;;  %vm4274_vm5 = vcmask 252928  }
 0x172   :  { %vm4275_vm6 = vmmov %vm4274_vm5 }
 0x174   :  { %v579_v36 = vpop.permute.xlu0 %578  ;;  %v581_v38 = vpop.permute.xlu1 %580 }
 0x175   :  { %v589_v40 = vsel %vm4272_vm9, %v3338_v13, %v579_v36  ;;  %v590_v17 = vsel %vm4273_vm7, %v579_v36, %v581_v38  ;;  %v875_v42 = vld [vmem:[#allocation2 + $0x1f0] sm:$0xff]  ;;  %v882_v2 = vld [vmem:[#allocation2 + $0x228] sm:$0xff]  ;;  %vm4276_vm7 = vcmask 244736  }
 0x176   :  { %v2630_v44 = vpack.c.bf16 %v882_v2, %v875_v42  ;;  %v2597_v47 = vpack.c.bf16 %v590_v17, %v552_v3  ;;  %v2599_v48 = vpack.c.bf16 %v589_v40, %v551_v33  ;;  %vm4277_vm9 = vmmov %vm4276_vm7  ;;  %v2611_v3 = vpack.c.bf16 %v3430_v39, %v957_v32 }
 0x178   :  { %v393_v45 = vpop.permute.xlu0 %392  ;;  %2631 = vmatpush1.bf16.msra.mxu1 %v2630_v44  ;;  %v431_v35 = vpop.permute.xlu1 %430  ;;  %2598 = vmatprep.subr.bf16.mxu0 %v2597_v47 }
 0x179   :  { %v401_v9 = vsel %vm394_vm10, %v3487_v55, %v393_v45  ;;  %v439_v5 = vsel %vm432_vm11, %v429_v52, %v431_v35  ;;  %2600 = vmatpush1.bf16.msra.mxu0 %v2599_v48  ;;  %2632 = vmatprep.subr.bf16.mxu1 %v2858_v18 }
 0x17a   :  { %415 = vst.msk [vmem:[#allocation2 + $0x260] sm:$0xff] %vm39_vm0, %v401_v9  ;;  %453 = vst.msk [vmem:[#allocation2 + $0x298] sm:$0xff] %vm39_vm0, %v439_v5 }
 0x17c   :  { %v617_v13 = vpop.permute.xlu0 %616  ;;  %v619_v6 = vpop.permute.xlu1 %618 }
 0x17d   :  { %v627_v49 = vsel %vm4274_vm5, %v3363_v34, %v617_v13  ;;  %v628_v50 = vsel %vm4275_vm6, %v617_v13, %v619_v6  ;;  %vm4278_vm5 = vcmask 490496   ;;  %vm4279_vm6 = vcmask 261120  }
 0x180   :  { %v655_v51 = vpop.permute.xlu0 %654  ;;  %v657_v53 = vpop.permute.xlu1 %656 }
 0x181   :  { %v665_v55 = vsel %vm4276_vm7, %v3372_v41, %v655_v51  ;;  %v666_v52 = vsel %vm4277_vm9, %v655_v51, %v657_v53  ;;  %v889_v57 = vld [vmem:[#allocation2 + $0x260] sm:$0xff]  ;;  %v896_v58 = vld [vmem:[#allocation2 + $0x298] sm:$0xff]  ;;  %vm4280_vm7 = vcmask 252928  }
 0x182   :  { %v2633_v60 = vpack.c.bf16 %v896_v58, %v889_v57  ;;  %v2601_v63 = vpack.c.bf16 %v666_v52, %v628_v50  ;;  %v2603_v8 = vpack.c.bf16 %v665_v55, %v627_v49  ;;  %v2859_v58 = vmov 0.0  }
 0x184   :  { %v469_v10 = vpop.permute.xlu0 %468  ;;  %2634 = vmatpush1.bf16.msra.mxu1 %v2633_v60  ;;  %v507_v12 = vpop.permute.xlu1 %506  ;;  %2602 = vmatprep.subr.bf16.mxu0 %v2601_v63 }
 0x185   :  { %v477_v34 = vsel %vm470_vm12, %v3501_v20, %v469_v10  ;;  %v515_v14 = vsel %vm508_vm13, %v505_v61, %v507_v12  ;;  %2604 = vmatpush1.bf16.msra.mxu0 %v2603_v8  ;;  %2635 = vmatprep.subr.bf16.mxu1 %v2858_v18 }
 0x186   :  { %491 = vst.msk [vmem:[#allocation2 + $0x2d0] sm:$0xff] %vm39_vm0, %v477_v34  ;;  %529 = vst.msk [vmem:[#allocation2 + $0x308] sm:$0xff] %vm39_vm0, %v515_v14 }
 0x188   :  { %v693_v41 = vpop.permute.xlu0 %692  ;;  %v695_v16 = vpop.permute.xlu1 %694 }
 0x189   :  { %v703_v19 = vsel %vm698_vm14, %v3397_v15, %v693_v41  ;;  %v704_v21 = vsel %vm698_vm14, %v693_v41, %v695_v16 }
 0x18c   :  { %v731_v22 = vpop.permute.xlu0 %730  ;;  %v733_v23 = vpop.permute.xlu1 %732 }
 0x18d   :  { %v741_v20 = vsel %vm736_vm15, %v3409_v25, %v731_v22  ;;  %v742_v61 = vsel %vm736_vm15, %v731_v22, %v733_v23  ;;  %v903_v0 = vld [vmem:[#allocation2 + $0x2d0] sm:$0xff]  ;;  %v910_v26 = vld [vmem:[#allocation2 + $0x308] sm:$0xff] }
 0x18e   :  { %v2636_v27 = vpack.c.bf16 %v910_v26, %v903_v0  ;;  %v2605_v28 = vpack.c.bf16 %v742_v61, %v704_v21  ;;  %v2607_v7 = vpack.c.bf16 %v741_v20, %v703_v19  ;;  %v958_v25 = vld [vmem:[#allocation2 + $0x488] sm:$0xff] }
 0x190   :  { %v545_v29 = vpop.permute.xlu0 %544  ;;  %2637 = vmatpush1.bf16.msra.mxu1 %v2636_v27  ;;  %v583_v1 = vpop.permute.xlu1 %582  ;;  %2606 = vmatprep.subr.bf16.mxu0 %v2605_v28 }
 0x191   :  { %v553_v15 = vsel %vm4278_vm5, %v3515_v24, %v545_v29  ;;  %v591_v30 = vsel %vm4279_vm6, %v581_v38, %v583_v1  ;;  %2608 = vmatpush1.bf16.msra.mxu0 %v2607_v7  ;;  %2638 = vmatprep.subr.bf16.mxu1 %v2858_v18  ;;  %vm1285_vm5 = vcmask 982016   ;;  %vm4281_vm6 = vcmask 777216  }
 0x192   :  { %567 = vst.msk [vmem:[#allocation2 + $0x340] sm:$0xff] %vm39_vm0, %v553_v15  ;;  %605 = vst.msk [vmem:[#allocation2 + $0x378] sm:$0xff] %vm39_vm0, %v591_v30 }
 0x194   :  { %v766_v31 = vpop.permute.xlu0 %765  ;;  %v621_v37 = vpop.permute.xlu1 %620 }
 0x195   :  { %v767_v4 = vsel %vm62_vm1, %v3426_v46, %v766_v31  ;;  %776 = vst.msk [vmem:[#allocation2 + $0x4c8] sm:$0xff] %vm39_vm0, %v766_v31  ;;  %v629_v24 = vsel %vm4280_vm7, %v619_v6, %v621_v37  ;;  %vm4282_vm7 = vmmov %vm4281_vm6 }
 0x196   :  { %643 = vst.msk [vmem:[#allocation2 + $0x3b0] sm:$0xff] %vm39_vm0, %v629_v24  ;;  %v2609_v33 = vpack.c.bf16 %v767_v4, %v958_v25 }
 0x198   :  { %v659_v36 = vpop.permute.xlu0 %658  ;;  %v778_v38 = vpop.permute.xlu1 %777  ;;  %2610 = vmatprep.subr.bf16.mxu0 %v2609_v33 }
 0x199   :  { %v667_v40 = vsel %vm4277_vm9, %v657_v53, %v659_v36  ;;  %v779_v17 = vsel %vm97_vm2, %v3440_v54, %v778_v38  ;;  %788 = vst.msk [vmem:[#allocation2 + $0x500] sm:$0xff] %vm39_vm0, %v778_v38  ;;  %v917_v46 = vld [vmem:[#allocation2 + $0x340] sm:$0xff]  ;;  %v924_v42 = vld [vmem:[#allocation2 + $0x378] sm:$0xff]  ;;  %2612 = vmatpush1.bf16.msra.mxu0 %v2611_v3  ;;  %vm4283_vm9 = vcmask 769024  }
 0x19a   :  { %681 = vst.msk [vmem:[#allocation2 + $0x3e8] sm:$0xff] %vm39_vm0, %v667_v40  ;;  %v2639_v2 = vpack.c.bf16 %v924_v42, %v917_v46 }
 0x19c   :  { %v790_v44 = vpop.permute.xlu0 %789  ;;  %2640 = vmatpush1.bf16.msra.mxu1 %v2639_v2  ;;  %v697_v47 = vpop.permute.xlu1 %696  ;;  %v966_v51 = vld [vmem:[#allocation2 + $0x4c8] sm:$0xff] }
 0x19d   :  { %v791_v39 = vsel %vm4269_vm3, %v3442_v56, %v790_v44  ;;  %800 = vst.msk [vmem:[#allocation2 + $0x538] sm:$0xff] %vm39_vm0, %v790_v44  ;;  %v705_v48 = vsel %vm698_vm14, %v695_v16, %v697_v47  ;;  %2641 = vmatprep.subr.bf16.mxu1 %v2858_v18  ;;  %v931_v56 = vld [vmem:[#allocation2 + $0x3b0] sm:$0xff] }
 0x19e   :  { %719 = vst.msk [vmem:[#allocation2 + $0x420] sm:$0xff] %vm39_vm0, %v705_v48  ;;  %v2613_v54 = vpack.c.bf16 %v791_v39, %v779_v17 }
 0x1a0   :  { %v735_v45 = vpop.permute.xlu0 %734  ;;  %v802_v35 = vpop.permute.xlu1 %801  ;;  %2614 = vmatprep.subr.bf16.mxu0 %v2613_v54 }
 0x1a1   :  { %v743_v9 = vsel %vm736_vm15, %v733_v23, %v735_v45  ;;  %v803_v5 = vsel %vm39_vm0, %v3454_v62, %v802_v35  ;;  %812 = vst.msk [vmem:[#allocation2 + $0x570] sm:$0xff] %vm39_vm0, %v802_v35  ;;  %v938_v13 = vld [vmem:[#allocation2 + $0x3e8] sm:$0xff]  ;;  %2616 = vmatpush1.bf16.msra.mxu0 %v3452_v59  ;;  %v959_v59 = vld [vmem:[#allocation2 + $0x490] sm:$0xff] }
 0x1a2   :  { %757 = vst.msk [vmem:[#allocation2 + $0x458] sm:$0xff] %vm39_vm0, %v743_v9  ;;  %v2642_v6 = vpack.c.bf16 %v938_v13, %v931_v56  ;;  %1187 = vmatprep.subr.mxu0 %v803_v5  ;;  %v3583_v62 = vld [vmem:[%s4254_s1 + $0x8] sm:$0xff]  ;;  %v2648_v55 = vpack.c.bf16 %v966_v51, %v959_v59 }
 0x1a4   :  { %2643 = vmatpush1.bf16.msra.mxu1 %v2642_v6  ;;  %v980_v52 = vld [vmem:[#allocation2 + $0x538] sm:$0xff] }
 0x1a5   :  { %2644 = vmatprep.subr.bf16.mxu1 %v2858_v18  ;;  %1188 = vmatpush1.msra.mxu0 %v3459_v11  ;;  %v945_v49 = vld [vmem:[#allocation2 + $0x420] sm:$0xff] }
 0x1a6   :  { %1204 = vmatmul.mubr.f32.vlgmr.msra.gmra.mrb[2].mxu0 %v3424_v43  ;;  %v973_v11 = vld [vmem:[#allocation2 + $0x500] sm:$0xff] }
 0x1a7   :  { %2470 = vmatprep.mubr.msk.f32.mxu0 %vm4267_vm8, %v3583_v62  ;;  %v2651_v57 = vpack.c.bf16 %v980_v52, %v973_v11 }
 0x1a8   :  { %v987_v60 = vld [vmem:[#allocation2 + $0x570] sm:$0xff] }
 0x1a9   :  { %v952_v50 = vld [vmem:[#allocation2 + $0x458] sm:$0xff] }
 0x1aa   :  { %v2645_v53 = vpack.c.bf16 %v952_v50, %v945_v49 }
 0x1ac   :  { %2646 = vmatpush1.bf16.msra.mxu1 %v2645_v53 }
 0x1ad   :  { %2647 = vmatprep.subr.bf16.mxu1 %v2858_v18 }
 0x1b0   :  { %2649 = vmatpush1.bf16.msra.mxu1 %v2648_v55 }
 0x1b1   :  { %2650 = vmatprep.subr.bf16.mxu1 %v2858_v18  ;;  %v3592_v63 = vpop.permute.xlu0 %990 }
 0x1b4   :  { %2652 = vmatpush1.bf16.msra.mxu1 %v2651_v57 }
 0x1b5   :  { %1258 = vmatprep.subr.mxu1 %v2859_v58 }
 0x1b8   :  { %1259 = vmatpush1.msra.mxu1 %v987_v60 }
 0x1b9   :  { %1275 = vmatmul.mubr.f32.vlgmr.msra.gmra.mrb[2].mxu1 %v3424_v43 }
 0x1ba   :  { %2471 = vmatprep.mubr.msk.f32.mxu1 %vm4267_vm8, %v3583_v62  ;;  %vm4284_vm8 = vmmov %vm4283_vm9 }
 0x20c   :  { %v1063_v8 = vpop.f32.mrb[0].mxu0 }
 0x20d   :  { %v3595_v10 = vadd.f32 %v1063_v8, %v3592_v63  ;;  %v1065_v12 = vpop.f32.mrb[1].mxu0 }
 0x20e   :  { %v3598_v34 = vadd.f32 %v1065_v12, %v3592_v63 }
 0x20f   :  { %1293 = vrot.lane.b32.xlu0 %v3595_v10, %s2838_s24 }
 0x215   :  { %v1134_v18 = vpop.f32.mrb[0].mxu1 }
 0x216   :  { %v3603_v14 = vadd.f32 %v1134_v18, %v3592_v63  ;;  %v1136_v43 = vpop.f32.mrb[1].mxu1 }
 0x217   :  { %v3606_v41 = vadd.f32 %v1136_v43, %v3592_v63 }
 0x218   :  { %1297 = vrot.lane.b32.xlu1 %v3603_v14, %s2838_s24  ;;  %1326 = vrot.lane.b32.xlu0 %v3603_v14, %s2839_s29 }
 0x219   :  { %1892 = vst [vmem:[#allocation3 + $0x3d0] sm:$0xff] %v3606_v41 }
 0x21c   :  { %1322 = vrot.lane.b32.xlu1 %v3595_v10, %s2839_s29  ;;  %1355 = vrot.lane.b32.xlu0 %v3603_v14, %s2840_s30 }
 0x220   :  { %1380 = vrot.lane.b32.xlu1 %v3595_v10, %s2841_s6  ;;  %1351 = vrot.lane.b32.xlu0 %v3595_v10, %s2840_s30 }
 0x224   :  { %1442 = vrot.lane.b32.xlu1 %v3595_v10, %s2843_s8  ;;  %1384 = vrot.lane.b32.xlu0 %v3603_v14, %s2841_s6 }
 0x228   :  { %1506 = vrot.lane.b32.xlu1 %v3595_v10, %s2845_s14  ;;  %1414 = vrot.lane.b32.xlu0 %v3603_v14, %s2842_s7 }
 0x22c   :  { %1570 = vrot.lane.b32.xlu1 %v3595_v10, %s2847_s16  ;;  %1410 = vrot.lane.b32.xlu0 %v3595_v10, %s2842_s7 }
 0x230   :  { %1634 = vrot.lane.b32.xlu1 %v3595_v10, %s2849_s0  ;;  %1446 = vrot.lane.b32.xlu0 %v3603_v14, %s2843_s8 }
 0x234   :  { %1698 = vrot.lane.b32.xlu1 %v3595_v10, %s2851_s21  ;;  %1478 = vrot.lane.b32.xlu0 %v3603_v14, %s2844_s9 }
 0x238   :  { %1295 = vrot.lane.b32.xlu1 %v3598_v34, %s2838_s24  ;;  %1474 = vrot.lane.b32.xlu0 %v3595_v10, %s2844_s9 }
 0x23c   :  { %1324 = vrot.lane.b32.xlu1 %v3598_v34, %s2839_s29  ;;  %1510 = vrot.lane.b32.xlu0 %v3603_v14, %s2845_s14 }
 0x240   :  { %1353 = vrot.lane.b32.xlu1 %v3598_v34, %s2840_s30  ;;  %1542 = vrot.lane.b32.xlu0 %v3603_v14, %s2846_s15 }
 0x244   :  { %1382 = vrot.lane.b32.xlu1 %v3598_v34, %s2841_s6  ;;  %1538 = vrot.lane.b32.xlu0 %v3595_v10, %s2846_s15 }
 0x248   :  { %1412 = vrot.lane.b32.xlu1 %v3598_v34, %s2842_s7  ;;  %1574 = vrot.lane.b32.xlu0 %v3603_v14, %s2847_s16 }
 0x24c   :  { %1444 = vrot.lane.b32.xlu1 %v3598_v34, %s2843_s8  ;;  %1606 = vrot.lane.b32.xlu0 %v3603_v14, %s2848_s17 }
 0x250   :  { %1476 = vrot.lane.b32.xlu1 %v3598_v34, %s2844_s9  ;;  %1602 = vrot.lane.b32.xlu0 %v3595_v10, %s2848_s17 }
 0x254   :  { %1508 = vrot.lane.b32.xlu1 %v3598_v34, %s2845_s14  ;;  %1638 = vrot.lane.b32.xlu0 %v3603_v14, %s2849_s0 }
 0x258   :  { %1540 = vrot.lane.b32.xlu1 %v3598_v34, %s2846_s15  ;;  %1670 = vrot.lane.b32.xlu0 %v3603_v14, %s2850_s20 }
 0x25c   :  { %1572 = vrot.lane.b32.xlu1 %v3598_v34, %s2847_s16  ;;  %1666 = vrot.lane.b32.xlu0 %v3595_v10, %s2850_s20 }
 0x260   :  { %1604 = vrot.lane.b32.xlu1 %v3598_v34, %s2848_s17  ;;  %1702 = vrot.lane.b32.xlu0 %v3603_v14, %s2851_s21 }
 0x264   :  { %1636 = vrot.lane.b32.xlu1 %v3598_v34, %s2849_s0  ;;  %1734 = vrot.lane.b32.xlu0 %v3603_v14, %s2852_s22 }
 0x268   :  { %1668 = vrot.lane.b32.xlu1 %v3598_v34, %s2850_s20  ;;  %1730 = vrot.lane.b32.xlu0 %v3595_v10, %s2852_s22 }
 0x26c   :  { %1700 = vrot.lane.b32.xlu1 %v3598_v34, %s2851_s21  ;;  %1766 = vrot.lane.b32.xlu0 %v3603_v14, %s2853_s23 }
 0x270   :  { %1732 = vrot.lane.b32.xlu1 %v3598_v34, %s2852_s22  ;;  %1798 = vrot.lane.b32.xlu0 %v3603_v14, %s2854_s25 }
 0x274   :  { %1764 = vrot.lane.b32.xlu1 %v3598_v34, %s2853_s23  ;;  %1794 = vrot.lane.b32.xlu0 %v3595_v10, %s2854_s25 }
 0x278   :  { %1796 = vrot.lane.b32.xlu1 %v3598_v34, %s2854_s25  ;;  %1830 = vrot.lane.b32.xlu0 %v3603_v14, %s2855_s26 }
 0x279   :  { %v1205_v16 = vpop.f32.mrb[2].mxu0 }
 0x27a   :  { %v3710_v19 = vadd.f32 %v1205_v16, %v3592_v63  ;;  %v1207_v21 = vpop.f32.mrb[3].mxu0 }
 0x27b   :  { %v3713_v22 = vadd.f32 %v1207_v21, %v3592_v63 }
 0x27c   :  { %1893 = vst [vmem:[#allocation3 + $0x3d8] sm:$0xff] %v3710_v19  ;;  %1762 = vrot.lane.b32.xlu1 %v3595_v10, %s2853_s23  ;;  %1862 = vrot.lane.b32.xlu0 %v3603_v14, %s2856_s27 }
 0x27d   :  { %1894 = vst [vmem:[#allocation3 + $0x3e0] sm:$0xff] %v3713_v22  ;;  %1286 = vst.msk [vmem:[#allocation3 + $0x28] sm:$0xff] %vm1285_vm5, %v3713_v22 }
 0x280   :  { %1828 = vrot.lane.b32.xlu1 %v3598_v34, %s2855_s26  ;;  %1858 = vrot.lane.b32.xlu0 %v3595_v10, %s2856_s27 }
 0x281   :  { %v1294_v23 = vpop.permute.xlu0 %1293 }
 0x284   :  { %1860 = vrot.lane.b32.xlu1 %v3598_v34, %s2856_s27  ;;  %1328 = vrot.lane.b32.xlu0 %v3606_v41, %s2839_s29 }
 0x288   :  { %1826 = vrot.lane.b32.xlu1 %v3595_v10, %s2855_s26  ;;  %1301 = vrot.lane.b32.xlu0 %v3710_v19, %s2838_s24 }
 0x28a   :  { %v3735_v20 = vpop.permute.xlu1 %1297  ;;  %v3737_v61 = vpop.permute.xlu0 %1326 }
 0x28c   :  { %v1276_v0 = vpop.f32.mrb[2].mxu1  ;;  %1299 = vrot.lane.b32.xlu1 %v3606_v41, %s2838_s24  ;;  %1359 = vrot.lane.b32.xlu0 %v3710_v19, %s2840_s30 }
 0x28d   :  { %v3744_v26 = vadd.f32 %v1276_v0, %v3592_v63  ;;  %v1278_v27 = vpop.f32.mrb[3].mxu1 }
 0x28e   :  { %v1323_v28 = vpop.permute.xlu1 %1322  ;;  %v3746_v7 = vpop.permute.xlu0 %1355 }
 0x28f   :  { %1895 = vst.msk [vmem:[#allocation3 + $0x3e8] sm:$0xff] %vm1285_vm5, %v3744_v26 }
 0x290   :  { %1357 = vrot.lane.b32.xlu1 %v3606_v41, %s2840_s30  ;;  %1303 = vrot.lane.b32.xlu0 %v3713_v22, %s2838_s24 }
 0x292   :  { %v1381_v29 = vpop.permute.xlu1 %1380  ;;  %v1352_v1 = vpop.permute.xlu0 %1351 }
 0x294   :  { %1386 = vrot.lane.b32.xlu1 %v3606_v41, %s2841_s6  ;;  %1361 = vrot.lane.b32.xlu0 %v3713_v22, %s2840_s30 }
 0x296   :  { %v3758_v15 = vpop.permute.xlu1 %1442  ;;  %v3760_v30 = vpop.permute.xlu0 %1384 }
 0x298   :  { %1330 = vrot.lane.b32.xlu1 %v3710_v19, %s2839_s29  ;;  %1416 = vrot.lane.b32.xlu0 %v3606_v41, %s2842_s7 }
 0x29a   :  { %v3766_v25 = vpop.permute.xlu1 %1506  ;;  %v3768_v31 = vpop.permute.xlu0 %1414 }
 0x29c   :  { %1388 = vrot.lane.b32.xlu1 %v3710_v19, %s2841_s6  ;;  %1420 = vrot.lane.b32.xlu0 %v3713_v22, %s2842_s7 }
 0x29e   :  { %v3774_v37 = vpop.permute.xlu1 %1570  ;;  %v1411_v32 = vpop.permute.xlu0 %1410 }
 0x2a0   :  { %1332 = vrot.lane.b32.xlu1 %v3713_v22, %s2839_s29  ;;  %1390 = vrot.lane.b32.xlu0 %v3713_v22, %s2841_s6 }
 0x2a2   :  { %v3780_v4 = vpop.permute.xlu1 %1634  ;;  %v3782_v24 = vpop.permute.xlu0 %1446 }
 0x2a4   :  { %1418 = vrot.lane.b32.xlu1 %v3710_v19, %s2842_s7  ;;  %1450 = vrot.lane.b32.xlu0 %v3710_v19, %s2843_s8 }
 0x2a6   :  { %v3788_v33 = vpop.permute.xlu1 %1698  ;;  %v3790_v3 = vpop.permute.xlu0 %1478 }
 0x2a8   :  { %1422 = vrot.lane.b32.xlu1 %v3744_v26, %s2842_s7  ;;  %1482 = vrot.lane.b32.xlu0 %v3710_v19, %s2844_s9 }
 0x2aa   :  { %v1296_v36 = vpop.permute.xlu1 %1295  ;;  %v1475_v38 = vpop.permute.xlu0 %1474 }
 0x2ab   :  { %v1305_v40 = vsel %vm62_vm1, %v1294_v23, %v1296_v36  ;;  %v1306_v17 = vsel %vm62_vm1, %v1296_v36, %v3735_v20 }
 0x2ac   :  { %1448 = vrot.lane.b32.xlu1 %v3606_v41, %s2843_s8  ;;  %1454 = vrot.lane.b32.xlu0 %v3744_v26, %s2843_s8  ;;  %v3804_v46 = vpack.c.bf16 %v1306_v17, %v3598_v34  ;;  %v2655_v42 = vpack.c.bf16 %v1305_v40, %v3595_v10 }
 0x2ae   :  { %v1325_v2 = vpop.permute.xlu1 %1324  ;;  %v3807_v44 = vpop.permute.xlu0 %1510  ;;  %2654 = vmatprep.subr.bf16.mxu0 %v3804_v46 }
 0x2af   :  { %v1334_v47 = vsel %vm97_vm2, %v1323_v28, %v1325_v2  ;;  %v1335_v39 = vsel %vm97_vm2, %v1325_v2, %v3737_v61  ;;  %2656 = vmatpush1.bf16.msra.mxu0 %v2655_v42 }
 0x2b0   :  { %1480 = vrot.lane.b32.xlu1 %v3606_v41, %s2844_s9  ;;  %1486 = vrot.lane.b32.xlu0 %v3744_v26, %s2844_s9 }
 0x2b2   :  { %v1354_v48 = vpop.permute.xlu1 %1353  ;;  %v3817_v54 = vpop.permute.xlu0 %1542 }
 0x2b3   :  { %v1363_v45 = vsel %vm4269_vm3, %v1352_v1, %v1354_v48  ;;  %v1364_v35 = vsel %vm4269_vm3, %v1354_v48, %v3746_v7 }
 0x2b4   :  { %1452 = vrot.lane.b32.xlu1 %v3713_v22, %s2843_s8  ;;  %1514 = vrot.lane.b32.xlu0 %v3710_v19, %s2845_s14  ;;  %v3826_v9 = vpack.c.bf16 %v1364_v35, %v1335_v39  ;;  %v2659_v5 = vpack.c.bf16 %v1363_v45, %v1334_v47 }
 0x2b6   :  { %v1383_v56 = vpop.permute.xlu1 %1382  ;;  %v1539_v13 = vpop.permute.xlu0 %1538  ;;  %2658 = vmatprep.subr.bf16.mxu0 %v3826_v9 }
 0x2b7   :  { %v1392_v6 = vsel %vm39_vm0, %v1381_v29, %v1383_v56  ;;  %v3832_v59 = vsel %vm39_vm0, %v1383_v56, %v3760_v30  ;;  %2660 = vmatpush1.bf16.msra.mxu0 %v2659_v5 }
 0x2b8   :  { %1484 = vrot.lane.b32.xlu1 %v3713_v22, %s2844_s9  ;;  %1546 = vrot.lane.b32.xlu0 %v3710_v19, %s2846_s15 }
 0x2ba   :  { %v1413_v49 = vpop.permute.xlu1 %1412  ;;  %v3838_v50 = vpop.permute.xlu0 %1574 }
 0x2bb   :  { %v1424_v51 = vsel %vm4268_vm4, %v1411_v32, %v1413_v49  ;;  %v1425_v53 = vsel %vm4268_vm4, %v1413_v49, %v3768_v31 }
 0x2bc   :  { %1512 = vrot.lane.b32.xlu1 %v3606_v41, %s2845_s14  ;;  %1518 = vrot.lane.b32.xlu0 %v3744_v26, %s2845_s14  ;;  %v2661_v55 = vpack.c.bf16 %v1425_v53, %v3832_v59  ;;  %v2663_v11 = vpack.c.bf16 %v1424_v51, %v1392_v6 }
 0x2be   :  { %v1445_v52 = vpop.permute.xlu1 %1444  ;;  %v3848_v57 = vpop.permute.xlu0 %1606  ;;  %2662 = vmatprep.subr.bf16.mxu0 %v2661_v55 }
 0x2bf   :  { %v1456_v58 = vsel %vm4281_vm6, %v3758_v15, %v1445_v52  ;;  %v1457_v60 = vsel %vm4282_vm7, %v1445_v52, %v3782_v24  ;;  %2664 = vmatpush1.bf16.msra.mxu0 %v2663_v11  ;;  %vm4285_vm6 = vcmask 760832  }
 0x2c0   :  { %1544 = vrot.lane.b32.xlu1 %v3606_v41, %s2846_s15  ;;  %1550 = vrot.lane.b32.xlu0 %v3744_v26, %s2846_s15  ;;  %vm4286_vm7 = vmmov %vm4285_vm6 }
 0x2c2   :  { %v1477_v8 = vpop.permute.xlu1 %1476  ;;  %v1603_v10 = vpop.permute.xlu0 %1602 }
 0x2c3   :  { %v1488_v12 = vsel %vm4283_vm9, %v1475_v38, %v1477_v8  ;;  %v1489_v34 = vsel %vm4284_vm8, %v1477_v8, %v3790_v3  ;;  %vm4287_vm8 = vcmask 752640  }
 0x2c4   :  { %1516 = vrot.lane.b32.xlu1 %v3713_v22, %s2845_s14  ;;  %1578 = vrot.lane.b32.xlu0 %v3710_v19, %s2847_s16  ;;  %v2665_v18 = vpack.c.bf16 %v1489_v34, %v1457_v60  ;;  %v2667_v43 = vpack.c.bf16 %v1488_v12, %v1456_v58  ;;  %vm4288_vm9 = vmmov %vm4287_vm8  ;;  %s2865_s14 = smov 72  }
 0x2c6   :  { %v1509_v16 = vpop.permute.xlu1 %1508  ;;  %v3865_v21 = vpop.permute.xlu0 %1638  ;;  %2666 = vmatprep.subr.bf16.mxu0 %v2665_v18 }
 0x2c7   :  { %v1520_v23 = vsel %vm4285_vm6, %v3766_v25, %v1509_v16  ;;  %v1521_v0 = vsel %vm4286_vm7, %v1509_v16, %v3807_v44  ;;  %2668 = vmatpush1.bf16.msra.mxu0 %v2667_v43  ;;  %vm4289_vm6 = vcmask 490496  }
 0x2c8   :  { %1548 = vrot.lane.b32.xlu1 %v3713_v22, %s2846_s15  ;;  %1610 = vrot.lane.b32.xlu0 %v3710_v19, %s2848_s17  ;;  %vm4290_vm7 = vmmov %vm4289_vm6  ;;  %s2866_s15 = smov 48  }
 0x2ca   :  { %v1541_v27 = vpop.permute.xlu1 %1540  ;;  %v3875_v28 = vpop.permute.xlu0 %1670 }
 0x2cb   :  { %v1552_v29 = vsel %vm4287_vm8, %v1539_v13, %v1541_v27  ;;  %v1553_v1 = vsel %vm4288_vm9, %v1541_v27, %v3817_v54  ;;  %vm4291_vm8 = vcmask 261120  }
 0x2cc   :  { %1576 = vrot.lane.b32.xlu1 %v3606_v41, %s2847_s16  ;;  %1582 = vrot.lane.b32.xlu0 %v3744_v26, %s2847_s16  ;;  %v2669_v15 = vpack.c.bf16 %v1553_v1, %v1521_v0  ;;  %v2671_v25 = vpack.c.bf16 %v1552_v29, %v1520_v23  ;;  %vm4292_vm9 = vmmov %vm4291_vm8 }
 0x2ce   :  { %v1573_v32 = vpop.permute.xlu1 %1572  ;;  %v1667_v36 = vpop.permute.xlu0 %1666  ;;  %2670 = vmatprep.subr.bf16.mxu0 %v2669_v15 }
 0x2cf   :  { %v1584_v38 = vsel %vm394_vm10, %v3774_v37, %v1573_v32  ;;  %v1585_v40 = vsel %vm394_vm10, %v1573_v32, %v3838_v50  ;;  %2672 = vmatpush1.bf16.msra.mxu0 %v2671_v25 }
 0x2d0   :  { %1608 = vrot.lane.b32.xlu1 %v3606_v41, %s2848_s17  ;;  %1614 = vrot.lane.b32.xlu0 %v3744_v26, %s2848_s17 }
 0x2d2   :  { %v1605_v17 = vpop.permute.xlu1 %1604  ;;  %v3892_v42 = vpop.permute.xlu0 %1702 }
 0x2d3   :  { %v1616_v2 = vsel %vm432_vm11, %v1603_v10, %v1605_v17  ;;  %v1617_v47 = vsel %vm432_vm11, %v1605_v17, %v3848_v57 }
 0x2d4   :  { %1580 = vrot.lane.b32.xlu1 %v3713_v22, %s2847_s16  ;;  %1642 = vrot.lane.b32.xlu0 %v3710_v19, %s2849_s0  ;;  %v2673_v37 = vpack.c.bf16 %v1617_v47, %v1585_v40  ;;  %v2675_v39 = vpack.c.bf16 %v1616_v2, %v1584_v38 }
 0x2d6   :  { %v1637_v48 = vpop.permute.xlu1 %1636  ;;  %v3901_v45 = vpop.permute.xlu0 %1734  ;;  %2674 = vmatprep.subr.bf16.mxu0 %v2673_v37 }
 0x2d7   :  { %v1648_v35 = vsel %vm470_vm12, %v3780_v4, %v1637_v48  ;;  %v1649_v5 = vsel %vm470_vm12, %v1637_v48, %v3865_v21  ;;  %2676 = vmatpush1.bf16.msra.mxu0 %v2675_v39 }
 0x2d8   :  { %1612 = vrot.lane.b32.xlu1 %v3713_v22, %s2848_s17  ;;  %1674 = vrot.lane.b32.xlu0 %v3710_v19, %s2850_s20  ;;  %s2867_s17 = smov 40  }
 0x2da   :  { %v1669_v56 = vpop.permute.xlu1 %1668  ;;  %v1731_v13 = vpop.permute.xlu0 %1730 }
 0x2db   :  { %v1680_v6 = vsel %vm508_vm13, %v1667_v36, %v1669_v56  ;;  %v1681_v49 = vsel %vm508_vm13, %v1669_v56, %v3875_v28 }
 0x2dc   :  { %1640 = vrot.lane.b32.xlu1 %v3606_v41, %s2849_s0  ;;  %1646 = vrot.lane.b32.xlu0 %v3744_v26, %s2849_s0  ;;  %v2677_v4 = vpack.c.bf16 %v1681_v49, %v1649_v5  ;;  %v2679_v51 = vpack.c.bf16 %v1680_v6, %v1648_v35 }
 0x2de   :  { %v1701_v53 = vpop.permute.xlu1 %1700  ;;  %v3918_v55 = vpop.permute.xlu0 %1766  ;;  %2678 = vmatprep.subr.bf16.mxu0 %v2677_v4 }
 0x2df   :  { %v1712_v11 = vsel %vm4289_vm6, %v3788_v33, %v1701_v53  ;;  %v1713_v52 = vsel %vm4290_vm7, %v1701_v53, %v3892_v42  ;;  %2680 = vmatpush1.bf16.msra.mxu0 %v2679_v51  ;;  %vm4293_vm6 = vcmask 252928   ;;  %vm4294_vm7 = vcmask 244736  }
 0x2e0   :  { %1672 = vrot.lane.b32.xlu1 %v3606_v41, %s2850_s20  ;;  %1678 = vrot.lane.b32.xlu0 %v3744_v26, %s2850_s20 }
 0x2e2   :  { %v1733_v58 = vpop.permute.xlu1 %1732  ;;  %v3928_v60 = vpop.permute.xlu0 %1798 }
 0x2e3   :  { %v1744_v8 = vsel %vm4291_vm8, %v1731_v13, %v1733_v58  ;;  %v1745_v10 = vsel %vm4292_vm9, %v1733_v58, %v3901_v45  ;;  %vm4295_vm8 = vmmov %vm4294_vm7 }
 0x2e4   :  { %1644 = vrot.lane.b32.xlu1 %v3713_v22, %s2849_s0  ;;  %1706 = vrot.lane.b32.xlu0 %v3710_v19, %s2851_s21  ;;  %v2681_v33 = vpack.c.bf16 %v1745_v10, %v1713_v52  ;;  %v2683_v12 = vpack.c.bf16 %v1744_v8, %v1712_v11  ;;  %vm4296_vm9 = vmmov %vm4293_vm6  ;;  %s2868_s0 = smov 56  }
 0x2e6   :  { %v1765_v34 = vpop.permute.xlu1 %1764  ;;  %v1795_v18 = vpop.permute.xlu0 %1794  ;;  %2682 = vmatprep.subr.bf16.mxu0 %v2681_v33 }
 0x2e7   :  { %v1777_v43 = vsel %vm4293_vm6, %v1765_v34, %v3918_v55  ;;  %2684 = vmatpush1.bf16.msra.mxu0 %v2683_v12  ;;  %vm4297_vm6 = vcmask 588800  }
 0x2e8   :  { %1676 = vrot.lane.b32.xlu1 %v3713_v22, %s2850_s20  ;;  %1738 = vrot.lane.b32.xlu0 %v3710_v19, %s2852_s22  ;;  %s2869_s20 = smov 24  }
 0x2ea   :  { %v1797_v16 = vpop.permute.xlu1 %1796  ;;  %v3943_v23 = vpop.permute.xlu0 %1830 }
 0x2eb   :  { %v1808_v0 = vsel %vm4294_vm7, %v1795_v18, %v1797_v16  ;;  %v1809_v27 = vsel %vm4295_vm8, %v1797_v16, %v3928_v60  ;;  %v1945_v18 = vld [vmem:[#allocation3 + $0x28] sm:$0xff]  ;;  %vm4298_vm7 = vcmask 777216  }
 0x2ec   :  { %1704 = vrot.lane.b32.xlu1 %v3606_v41, %s2851_s21  ;;  %1710 = vrot.lane.b32.xlu0 %v3744_v26, %s2851_s21  ;;  %v2685_v29 = vpack.c.bf16 %v1809_v27, %v1777_v43  ;;  %vm4299_vm8 = vmmov %vm4298_vm7 }
 0x2ee   :  { %v1763_v1 = vpop.permute.xlu1 %1762  ;;  %v3952_v15 = vpop.permute.xlu0 %1862  ;;  %2686 = vmatprep.subr.bf16.mxu0 %v2685_v29  ;;  %v4035_v29 = vld [vmem:[%s4254_s1] sm:$0xff]  ;;  %s2860_s1 = smov 112  }
 0x2ef   :  { %v1776_v25 = vsel %vm4296_vm9, %v1763_v1, %v1765_v34  ;;  %vm4300_vm9 = vcmask 769024  }
 0x2f0   :  { %1736 = vrot.lane.b32.xlu1 %v3606_v41, %s2852_s22  ;;  %1742 = vrot.lane.b32.xlu0 %v3744_v26, %s2852_s22  ;;  %v2687_v32 = vpack.c.bf16 %v1808_v0, %v1776_v25 }
 0x2f2   :  { %v1829_v36 = vpop.permute.xlu1 %1828  ;;  %v1859_v38 = vpop.permute.xlu0 %1858  ;;  %2688 = vmatpush1.bf16.msra.mxu0 %v2687_v32 }
 0x2f3   :  { %v1841_v40 = vsel %vm698_vm14, %v1829_v36, %v3943_v23 }
 0x2f4   :  { %1708 = vrot.lane.b32.xlu1 %v3713_v22, %s2851_s21  ;;  %1770 = vrot.lane.b32.xlu0 %v3710_v19, %s2853_s23  ;;  %s2870_s21 = smov 16  }
 0x2f6   :  { %v1861_v17 = vpop.permute.xlu1 %1860  ;;  %v1329_v2 = vpop.permute.xlu0 %1328 }
 0x2f7   :  { %v1872_v47 = vsel %vm736_vm15, %v1859_v38, %v1861_v17  ;;  %v1873_v37 = vsel %vm736_vm15, %v1861_v17, %v3952_v15  ;;  %v1336_v39 = vsel %vm97_vm2, %v3737_v61, %v1329_v2 }
 0x2f8   :  { %1740 = vrot.lane.b32.xlu1 %v3713_v22, %s2852_s22  ;;  %1802 = vrot.lane.b32.xlu0 %v3710_v19, %s2854_s25  ;;  %v2689_v48 = vpack.c.bf16 %v1873_v37, %v1841_v40 }
 0x2fa   :  { %v1827_v35 = vpop.permute.xlu1 %1826  ;;  %v1302_v5 = vpop.permute.xlu0 %1301  ;;  %2690 = vmatprep.subr.bf16.mxu0 %v2689_v48 }
 0x2fb   :  { %v1840_v56 = vsel %vm698_vm14, %v1827_v35, %v1829_v36 }
 0x2fc   :  { %1768 = vrot.lane.b32.xlu1 %v3606_v41, %s2853_s23  ;;  %1774 = vrot.lane.b32.xlu0 %v3744_v26, %s2853_s23  ;;  %v2691_v13 = vpack.c.bf16 %v1872_v47, %v1840_v56 }
 0x2fe   :  { %v1300_v61 = vpop.permute.xlu1 %1299  ;;  %v1360_v6 = vpop.permute.xlu0 %1359  ;;  %2692 = vmatpush1.bf16.msra.mxu0 %v2691_v13 }
 0x2ff   :  { %v1307_v49 = vsel %vm62_vm1, %v3735_v20, %v1300_v61  ;;  %v3982_v4 = vsel %vm62_vm1, %v1300_v61, %v1302_v5 }
 0x300   :  { %1800 = vrot.lane.b32.xlu1 %v3606_v41, %s2854_s25  ;;  %1806 = vrot.lane.b32.xlu0 %v3744_v26, %s2854_s25  ;;  %v2701_v51 = vpack.c.bf16 %v3982_v4, %v3606_v41  ;;  %v2693_v53 = vpack.c.bf16 %v1307_v49, %v3603_v14 }
 0x302   :  { %v1358_v11 = vpop.permute.xlu1 %1357  ;;  %v3991_v52 = vpop.permute.xlu0 %1303  ;;  %2702 = vmatprep.subr.bf16.mxu1 %v2701_v51  ;;  %2694 = vmatprep.subr.bf16.mxu0 %v2693_v53 }
 0x303   :  { %v1365_v20 = vsel %vm4269_vm3, %v3746_v7, %v1358_v11  ;;  %v1366_v58 = vsel %vm4269_vm3, %v1358_v11, %v1360_v6  ;;  %v3998_v8 = vsel %vm62_vm1, %v1302_v5, %v3991_v52  ;;  %1321 = vst.msk [vmem:[#allocation3 + $0x58] sm:$0xff] %vm1285_vm5, %v3991_v52  ;;  %2696 = vmatpush1.bf16.msra.mxu0 %v3804_v46 }
 0x304   :  { %2704 = vmatpush1.bf16.msra.mxu1 %v2693_v53  ;;  %1772 = vrot.lane.b32.xlu1 %v3713_v22, %s2853_s23  ;;  %v2697_v14 = vpack.c.bf16 %v1365_v20, %v1336_v39 }
 0x305   :  { %1834 = vrot.lane.b32.xlu0 %v3710_v19, %s2855_s26 }
 0x306   :  { %v1387_v7 = vpop.permute.xlu1 %1386  ;;  %v4007_v10 = vpop.permute.xlu0 %1361  ;;  %2698 = vmatprep.subr.bf16.mxu0 %v2697_v14 }
 0x307   :  { %v1394_v33 = vsel %vm39_vm0, %v3760_v30, %v1387_v7  ;;  %v1367_v12 = vsel %vm4269_vm3, %v1360_v6, %v4007_v10  ;;  %1379 = vst.msk [vmem:[#allocation3 + $0xb8] sm:$0xff] %vm1285_vm5, %v4007_v10  ;;  %2700 = vmatpush1.bf16.msra.mxu0 %v3826_v9  ;;  %v2751_v9 = vpack.c.bf16 %v3998_v8, %v3710_v19 }
 0x308   :  { %1804 = vrot.lane.b32.xlu1 %v3713_v22, %s2854_s25  ;;  %2138 = vmatprep.subr.mxu0 %v1394_v33 }
 0x309   :  { %1866 = vrot.lane.b32.xlu0 %v3710_v19, %s2856_s27 }
 0x30a   :  { %v1331_v46 = vpop.permute.xlu1 %1330  ;;  %v1417_v34 = vpop.permute.xlu0 %1416  ;;  %v1951_v43 = vld [vmem:[#allocation3 + $0x58] sm:$0xff] }
 0x30b   :  { %v1337_v30 = vsel %vm97_vm2, %v1329_v2, %v1331_v46  ;;  %v1426_v16 = vsel %vm4268_vm4, %v3768_v31, %v1417_v34  ;;  %2139 = vmatpush1.msra.mxu0 %v3832_v59  ;;  %v2749_v0 = vpack.c.bf16 %v1951_v43, %v1945_v18 }
 0x30c   :  { %1832 = vrot.lane.b32.xlu1 %v3606_v41, %s2855_s26  ;;  %v4030_v27 = vpack.c.bf16 %v1366_v58, %v1337_v30  ;;  %2155 = vmatmul.mubr.f32.vlgmr.msra.gmra.mrb[4].mxu0 %v4035_v29  ;;  %v2711_v2 = vpack.c.bf16 %v1426_v16, %v1394_v33 }
 0x30d   :  { %1838 = vrot.lane.b32.xlu0 %v3744_v26, %s2855_s26  ;;  %2750 = vmatprep.subr.bf16.mxu0 %v2749_v0 }
 0x30e   :  { %v1389_v31 = vpop.permute.xlu1 %1388  ;;  %v1421_v59 = vpop.permute.xlu0 %1420  ;;  %2752 = vmatpush1.bf16.msra.mxu0 %v2751_v9  ;;  %2706 = vmatprep.subr.bf16.mxu1 %v4030_v27  ;;  %v1963_v48 = vld [vmem:[#allocation3 + $0xb8] sm:$0xff] }
 0x30f   :  { %v4040_v1 = vsel %vm39_vm0, %v1387_v7, %v1389_v31  ;;  %2708 = vmatpush1.bf16.msra.mxu1 %v2697_v14  ;;  %2472 = vmatprep.mubr.msk.f32.mxu0 %vm4297_vm6, %v3583_v62  ;;  %vm4301_vm6 = vmmov %vm4300_vm9 }
 0x310   :  { %1864 = vrot.lane.b32.xlu1 %v3606_v41, %s2856_s27 }
 0x311   :  { %1870 = vrot.lane.b32.xlu0 %v3744_v26, %s2856_s27 }
 0x312   :  { %v4048_v19 = vpop.permute.xlu1 %1332  ;;  %v4050_v25 = vpop.permute.xlu0 %1390 }
 0x313   :  { %v1338_v32 = vsel %vm97_vm2, %v1331_v46, %v4048_v19  ;;  %1350 = vst.msk [vmem:[#allocation3 + $0x88] sm:$0xff] %vm1285_vm5, %v4048_v19  ;;  %v4058_v36 = vsel %vm39_vm0, %v1389_v31, %v4050_v25  ;;  %1408 = vst.msk [vmem:[#allocation3 + $0xe8] sm:$0xff] %vm1285_vm5, %v4050_v25 }
 0x314   :  { %1836 = vrot.lane.b32.xlu1 %v3713_v22, %s2855_s26 }
 0x315   :  { %1907 = vrot.lane.b32.xlu0 %v3744_v26, %s2839_s29  ;;  %s2862_s29 = smov 104  }
 0x316   :  { %v1419_v62 = vpop.permute.xlu1 %1418  ;;  %v1451_v41 = vpop.permute.xlu0 %1450 }
 0x317   :  { %v1427_v38 = vsel %vm4268_vm4, %v1417_v34, %v1419_v62  ;;  %v1428_v40 = vsel %vm4268_vm4, %v1419_v62, %v1421_v59 }
 0x318   :  { %1868 = vrot.lane.b32.xlu1 %v3713_v22, %s2856_s27  ;;  %v2709_v17 = vpack.c.bf16 %v1427_v38, %v4040_v1  ;;  %v4077_v22 = vpack.c.bf16 %v1367_v12, %v1338_v32  ;;  %v2759_v12 = vpack.c.bf16 %v1428_v40, %v4058_v36 }
 0x319   :  { %1929 = vrot.lane.b32.xlu0 %v3744_v26, %s2841_s6  ;;  %s2864_s6 = smov 88  }
 0x31a   :  { %v1423_v47 = vpop.permute.xlu1 %1422  ;;  %v1483_v37 = vpop.permute.xlu0 %1482  ;;  %v1957_v39 = vld [vmem:[#allocation3 + $0x88] sm:$0xff]  ;;  %2710 = vmatprep.subr.bf16.mxu1 %v2709_v17 }
 0x31b   :  { %v1429_v35 = vsel %vm4268_vm4, %v1421_v59, %v1423_v47  ;;  %v2753_v5 = vpack.c.bf16 %v1963_v48, %v1957_v39  ;;  %2712 = vmatpush1.bf16.msra.mxu1 %v2711_v2  ;;  %v1969_v20 = vld [vmem:[#allocation3 + $0xe8] sm:$0xff]  ;;  %vm4304_vm4 = vcmask 760832  }
 0x31c   :  { %1441 = vst.msk [vmem:[#allocation3 + $0x118] sm:$0xff] %vm1285_vm5, %v1429_v35  ;;  %1896 = vrot.lane.b32.xlu1 %v3744_v26, %s2838_s24  ;;  %s2861_s24 = smov 120  }
 0x31d   :  { %2754 = vmatprep.subr.bf16.mxu0 %v2753_v5 }
 0x31e   :  { %v1449_v56 = vpop.permute.xlu1 %1448  ;;  %v1455_v13 = vpop.permute.xlu0 %1454  ;;  %2756 = vmatpush1.bf16.msra.mxu0 %v4077_v22 }
 0x31f   :  { %v1458_v61 = vsel %vm4298_vm7, %v3782_v24, %v1449_v56  ;;  %v1459_v6 = vsel %vm4299_vm8, %v1449_v56, %v1451_v41  ;;  %vm4302_vm8 = vmmov %vm4298_vm7 }
 0x320   :  { %1918 = vrot.lane.b32.xlu1 %v3744_v26, %s2840_s30  ;;  %s2863_s30 = smov 80  }
 0x322   :  { %v1481_v49 = vpop.permute.xlu1 %1480  ;;  %v1487_v51 = vpop.permute.xlu0 %1486 }
 0x323   :  { %v1490_v53 = vsel %vm4300_vm9, %v3790_v3, %v1481_v49  ;;  %v1491_v11 = vsel %vm4301_vm6, %v1481_v49, %v1483_v37  ;;  %v1975_v58 = vld [vmem:[#allocation3 + $0x118] sm:$0xff]  ;;  %vm4303_vm9 = vmmov %vm4301_vm6 }
 0x324   :  { %v2757_v14 = vpack.c.bf16 %v1975_v58, %v1969_v20  ;;  %v2713_v7 = vpack.c.bf16 %v1491_v11, %v1459_v6  ;;  %v2715_v33 = vpack.c.bf16 %v1490_v53, %v1458_v61 }
 0x326   :  { %v1453_v24 = vpop.permute.xlu1 %1452  ;;  %v1515_v46 = vpop.permute.xlu0 %1514  ;;  %2758 = vmatprep.subr.bf16.mxu0 %v2757_v14  ;;  %2714 = vmatprep.subr.bf16.mxu1 %v2713_v7 }
 0x327   :  { %v1460_v26 = vsel %vm4298_vm7, %v1451_v41, %v1453_v24  ;;  %v1461_v34 = vsel %vm4302_vm8, %v1453_v24, %v1455_v13  ;;  %2760 = vmatpush1.bf16.msra.mxu0 %v2759_v12  ;;  %2716 = vmatpush1.bf16.msra.mxu1 %v2715_v33  ;;  %vm4305_vm7 = vmmov %vm4304_vm4  ;;  %vm4306_vm8 = vcmask 752640  }
 0x328   :  { %1473 = vst.msk [vmem:[#allocation3 + $0x148] sm:$0xff] %vm1285_vm5, %v1461_v34  ;;  %vm4307_vm3 = vmmov %vm4306_vm8 }
 0x32a   :  { %v1485_v3 = vpop.permute.xlu1 %1484  ;;  %v1547_v18 = vpop.permute.xlu0 %1546 }
 0x32b   :  { %v1492_v43 = vsel %vm4303_vm9, %v1483_v37, %v1485_v3  ;;  %v1493_v30 = vsel %vm4301_vm6, %v1485_v3, %v1487_v51  ;;  %vm4308_vm9 = vmmov %vm4304_vm4 }
 0x32c   :  { %1505 = vst.msk [vmem:[#allocation3 + $0x178] sm:$0xff] %vm1285_vm5, %v1493_v30  ;;  %v2763_v37 = vpack.c.bf16 %v1492_v43, %v1460_v26  ;;  %vm4309_vm6 = vmmov %vm4307_vm3 }
 0x32e   :  { %v1513_v16 = vpop.permute.xlu1 %1512  ;;  %v1519_v0 = vpop.permute.xlu0 %1518 }
 0x32f   :  { %v1522_v9 = vsel %vm4304_vm4, %v3807_v44, %v1513_v16  ;;  %v1523_v31 = vsel %vm4305_vm7, %v1513_v16, %v1515_v46  ;;  %v1981_v38 = vld [vmem:[#allocation3 + $0x148] sm:$0xff] }
 0x332   :  { %v1545_v59 = vpop.permute.xlu1 %1544  ;;  %v1551_v32 = vpop.permute.xlu0 %1550 }
 0x333   :  { %v1554_v62 = vsel %vm4306_vm8, %v3817_v54, %v1545_v59  ;;  %v1555_v41 = vsel %vm4307_vm3, %v1545_v59, %v1547_v18  ;;  %v1987_v40 = vld [vmem:[#allocation3 + $0x178] sm:$0xff] }
 0x334   :  { %v2761_v17 = vpack.c.bf16 %v1987_v40, %v1981_v38  ;;  %v2717_v2 = vpack.c.bf16 %v1555_v41, %v1523_v31  ;;  %v2719_v47 = vpack.c.bf16 %v1554_v62, %v1522_v9 }
 0x336   :  { %v1517_v39 = vpop.permute.xlu1 %1516  ;;  %v1579_v48 = vpop.permute.xlu0 %1578  ;;  %2762 = vmatprep.subr.bf16.mxu0 %v2761_v17  ;;  %2718 = vmatprep.subr.bf16.mxu1 %v2717_v2 }
 0x337   :  { %v1524_v44 = vsel %vm4304_vm4, %v1515_v46, %v1517_v39  ;;  %v1525_v35 = vsel %vm4308_vm9, %v1517_v39, %v1519_v0  ;;  %2764 = vmatpush1.bf16.msra.mxu0 %v2763_v37  ;;  %2720 = vmatpush1.bf16.msra.mxu1 %v2719_v47 }
 0x338   :  { %1537 = vst.msk [vmem:[#allocation3 + $0x1a8] sm:$0xff] %vm1285_vm5, %v1525_v35 }
 0x33a   :  { %v1549_v54 = vpop.permute.xlu1 %1548  ;;  %v1611_v5 = vpop.permute.xlu0 %1610 }
 0x33b   :  { %v1556_v56 = vsel %vm4307_vm3, %v1547_v18, %v1549_v54  ;;  %v1557_v13 = vsel %vm4309_vm6, %v1549_v54, %v1551_v32  ;;  %vm4318_vm6 = vcmask 252928  }
 0x33c   :  { %1569 = vst.msk [vmem:[#allocation3 + $0x1d8] sm:$0xff] %vm1285_vm5, %v1557_v13  ;;  %v2767_v46 = vpack.c.bf16 %v1556_v56, %v1524_v44 }
 0x33e   :  { %v1577_v61 = vpop.permute.xlu1 %1576  ;;  %v1583_v6 = vpop.permute.xlu0 %1582 }
 0x33f   :  { %v1586_v49 = vsel %vm394_vm10, %v3838_v50, %v1577_v61  ;;  %v1587_v51 = vsel %vm394_vm10, %v1577_v61, %v1579_v48  ;;  %v1993_v14 = vld [vmem:[#allocation3 + $0x1a8] sm:$0xff] }
 0x342   :  { %v1609_v53 = vpop.permute.xlu1 %1608  ;;  %v1615_v11 = vpop.permute.xlu0 %1614 }
 0x343   :  { %v1618_v20 = vsel %vm432_vm11, %v3848_v57, %v1609_v53  ;;  %v1619_v58 = vsel %vm432_vm11, %v1609_v53, %v1611_v5  ;;  %v1999_v7 = vld [vmem:[#allocation3 + $0x1d8] sm:$0xff] }
 0x344   :  { %v2765_v33 = vpack.c.bf16 %v1999_v7, %v1993_v14  ;;  %v2721_v12 = vpack.c.bf16 %v1619_v58, %v1587_v51  ;;  %v2723_v24 = vpack.c.bf16 %v1618_v20, %v1586_v49 }
 0x346   :  { %v1581_v26 = vpop.permute.xlu1 %1580  ;;  %v1643_v34 = vpop.permute.xlu0 %1642  ;;  %2766 = vmatprep.subr.bf16.mxu0 %v2765_v33  ;;  %2722 = vmatprep.subr.bf16.mxu1 %v2721_v12 }
 0x347   :  { %v1588_v50 = vsel %vm394_vm10, %v1579_v48, %v1581_v26  ;;  %v1589_v3 = vsel %vm394_vm10, %v1581_v26, %v1583_v6  ;;  %2768 = vmatpush1.bf16.msra.mxu0 %v2767_v46  ;;  %2724 = vmatpush1.bf16.msra.mxu1 %v2723_v24 }
 0x348   :  { %1601 = vst.msk [vmem:[#allocation3 + $0x208] sm:$0xff] %vm1285_vm5, %v1589_v3 }
 0x34a   :  { %v1613_v57 = vpop.permute.xlu1 %1612  ;;  %v1675_v18 = vpop.permute.xlu0 %1674 }
 0x34b   :  { %v1620_v43 = vsel %vm432_vm11, %v1611_v5, %v1613_v57  ;;  %v1621_v30 = vsel %vm432_vm11, %v1613_v57, %v1615_v11  ;;  %vm4310_vm11 = vcmask 490496  }
 0x34c   :  { %1633 = vst.msk [vmem:[#allocation3 + $0x238] sm:$0xff] %vm1285_vm5, %v1621_v30  ;;  %v2771_v37 = vpack.c.bf16 %v1620_v43, %v1588_v50  ;;  %vm4311_vm7 = vmmov %vm4310_vm11 }
 0x34d   :  { %vm4315_vm4 = vmmov %vm4311_vm7 }
 0x34e   :  { %v1641_v16 = vpop.permute.xlu1 %1640  ;;  %v1647_v0 = vpop.permute.xlu0 %1646 }
 0x34f   :  { %v1650_v9 = vsel %vm470_vm12, %v3865_v21, %v1641_v16  ;;  %v1651_v31 = vsel %vm470_vm12, %v1641_v16, %v1643_v34  ;;  %v2005_v38 = vld [vmem:[#allocation3 + $0x208] sm:$0xff] }
 0x352   :  { %v1673_v59 = vpop.permute.xlu1 %1672  ;;  %v1679_v32 = vpop.permute.xlu0 %1678 }
 0x353   :  { %v1682_v62 = vsel %vm508_vm13, %v3875_v28, %v1673_v59  ;;  %v1683_v41 = vsel %vm508_vm13, %v1673_v59, %v1675_v18  ;;  %v2011_v40 = vld [vmem:[#allocation3 + $0x238] sm:$0xff] }
 0x354   :  { %v2769_v17 = vpack.c.bf16 %v2011_v40, %v2005_v38  ;;  %v2725_v2 = vpack.c.bf16 %v1683_v41, %v1651_v31  ;;  %v2727_v47 = vpack.c.bf16 %v1682_v62, %v1650_v9 }
 0x356   :  { %v1645_v39 = vpop.permute.xlu1 %1644  ;;  %v1707_v48 = vpop.permute.xlu0 %1706  ;;  %2770 = vmatprep.subr.bf16.mxu0 %v2769_v17  ;;  %2726 = vmatprep.subr.bf16.mxu1 %v2725_v2 }
 0x357   :  { %v1652_v21 = vsel %vm470_vm12, %v1643_v34, %v1645_v39  ;;  %v1653_v44 = vsel %vm470_vm12, %v1645_v39, %v1647_v0  ;;  %2772 = vmatpush1.bf16.msra.mxu0 %v2771_v37  ;;  %2728 = vmatpush1.bf16.msra.mxu1 %v2727_v47  ;;  %vm4312_vm12 = vcmask 261120  }
 0x358   :  { %1665 = vst.msk [vmem:[#allocation3 + $0x268] sm:$0xff] %vm1285_vm5, %v1653_v44  ;;  %vm4313_vm8 = vmmov %vm4312_vm12 }
 0x359   :  { %vm4316_vm9 = vmmov %vm4313_vm8 }
 0x35a   :  { %v1677_v28 = vpop.permute.xlu1 %1676  ;;  %v1739_v35 = vpop.permute.xlu0 %1738  ;;  %vm4317_vm3 = vmmov %vm4313_vm8 }
 0x35b   :  { %v1684_v54 = vsel %vm508_vm13, %v1675_v18, %v1677_v28  ;;  %v1685_v5 = vsel %vm508_vm13, %v1677_v28, %v1679_v32  ;;  %vm4314_vm13 = vmmov %vm4311_vm7 }
 0x35c   :  { %1697 = vst.msk [vmem:[#allocation3 + $0x298] sm:$0xff] %vm1285_vm5, %v1685_v5  ;;  %v2775_v12 = vpack.c.bf16 %v1684_v54, %v1652_v21 }
 0x35e   :  { %v1705_v56 = vpop.permute.xlu1 %1704  ;;  %v1711_v13 = vpop.permute.xlu0 %1710 }
 0x35f   :  { %v1714_v61 = vsel %vm4310_vm11, %v3892_v42, %v1705_v56  ;;  %v1715_v6 = vsel %vm4311_vm7, %v1705_v56, %v1707_v48  ;;  %v2017_v20 = vld [vmem:[#allocation3 + $0x268] sm:$0xff]  ;;  %vm4319_vm11 = vmmov %vm4318_vm6  ;;  %vm4320_vm7 = vcmask 244736  }
 0x362   :  { %v1737_v49 = vpop.permute.xlu1 %1736  ;;  %v1743_v51 = vpop.permute.xlu0 %1742 }
 0x363   :  { %v1746_v53 = vsel %vm4312_vm12, %v3901_v45, %v1737_v49  ;;  %v1747_v11 = vsel %vm4313_vm8, %v1737_v49, %v1739_v35  ;;  %v2023_v58 = vld [vmem:[#allocation3 + $0x298] sm:$0xff]  ;;  %vm4321_vm12 = vmmov %vm4320_vm7 }
 0x364   :  { %v2773_v14 = vpack.c.bf16 %v2023_v58, %v2017_v20  ;;  %v2729_v7 = vpack.c.bf16 %v1747_v11, %v1715_v6  ;;  %v2731_v33 = vpack.c.bf16 %v1746_v53, %v1714_v61  ;;  %vm4322_vm8 = vmmov %vm4318_vm6  ;;  %v2063_v20 = vld [vmem:[#allocation3 + $0x3d8] sm:$0xff] }
 0x366   :  { %v1709_v24 = vpop.permute.xlu1 %1708  ;;  %v1771_v46 = vpop.permute.xlu0 %1770  ;;  %2774 = vmatprep.subr.bf16.mxu0 %v2773_v14  ;;  %2730 = vmatprep.subr.bf16.mxu1 %v2729_v7 }
 0x367   :  { %v1716_v42 = vsel %vm4314_vm13, %v1707_v48, %v1709_v24  ;;  %v1717_v26 = vsel %vm4315_vm4, %v1709_v24, %v1711_v13  ;;  %2776 = vmatpush1.bf16.msra.mxu0 %v2775_v12  ;;  %2732 = vmatpush1.bf16.msra.mxu1 %v2731_v33  ;;  %vm4323_vm13 = vmmov %vm4318_vm6  ;;  %v2062_v12 = vld [vmem:[#allocation3 + $0x3d0] sm:$0xff] }
 0x368   :  { %1729 = vst.msk [vmem:[#allocation3 + $0x2c8] sm:$0xff] %vm1285_vm5, %v1717_v26  ;;  %vm4324_vm4 = vmmov %vm4320_vm7  ;;  %v2743_v24 = vpack.c.bf16 %v3982_v4, %v2062_v12 }
 0x36a   :  { %v1741_v45 = vpop.permute.xlu1 %1740  ;;  %v1803_v34 = vpop.permute.xlu0 %1802 }
 0x36b   :  { %v1748_v50 = vsel %vm4316_vm9, %v1739_v35, %v1741_v45  ;;  %v1749_v3 = vsel %vm4317_vm3, %v1741_v45, %v1743_v51  ;;  %vm4325_vm9 = vmmov %vm4324_vm4  ;;  %vm2354_vm3 = vcmask 392192  }
 0x36c   :  { %1761 = vst.msk [vmem:[#allocation3 + $0x2f8] sm:$0xff] %vm1285_vm5, %v1749_v3  ;;  %v2779_v40 = vpack.c.bf16 %v1748_v50, %v1716_v42 }
 0x36e   :  { %v1769_v57 = vpop.permute.xlu1 %1768  ;;  %v1775_v18 = vpop.permute.xlu0 %1774 }
 0x36f   :  { %v1778_v43 = vsel %vm4318_vm6, %v3918_v55, %v1769_v57  ;;  %v1779_v30 = vsel %vm4319_vm11, %v1769_v57, %v1771_v46  ;;  %v2029_v59 = vld [vmem:[#allocation3 + $0x2c8] sm:$0xff]  ;;  %vm2364_vm6 = vcmask 719872   ;;  %vm2366_vm11 = vcmask 916480  }
 0x370   :  { %v2065_v57 = vld [vmem:[#allocation3 + $0x3e8] sm:$0xff] }
 0x372   :  { %v1801_v16 = vpop.permute.xlu1 %1800  ;;  %v1807_v0 = vpop.permute.xlu0 %1806 }
 0x373   :  { %v1810_v9 = vsel %vm4320_vm7, %v3928_v60, %v1801_v16  ;;  %v1811_v31 = vsel %vm4321_vm12, %v1801_v16, %v1803_v34  ;;  %v2035_v32 = vld [vmem:[#allocation3 + $0x2f8] sm:$0xff]  ;;  %vm2371_vm7 = vcmask 457728   ;;  %vm4327_vm12 = vcmask 588800  }
 0x374   :  { %v2777_v62 = vpack.c.bf16 %v2035_v32, %v2029_v59  ;;  %v2733_v41 = vpack.c.bf16 %v1811_v31, %v1779_v30  ;;  %v2735_v38 = vpack.c.bf16 %v1810_v9, %v1778_v43 }
 0x376   :  { %v1773_v17 = vpop.permute.xlu1 %1772  ;;  %2778 = vmatprep.subr.bf16.mxu0 %v2777_v62  ;;  %2734 = vmatprep.subr.bf16.mxu1 %v2733_v41 }
 0x377   :  { %v1835_v2 = vpop.permute.xlu0 %1834  ;;  %v1780_v55 = vsel %vm4322_vm8, %v1771_v46, %v1773_v17  ;;  %v1781_v47 = vsel %vm4323_vm13, %v1773_v17, %v1775_v18  ;;  %2780 = vmatpush1.bf16.msra.mxu0 %v2779_v40  ;;  %2736 = vmatpush1.bf16.msra.mxu1 %v2735_v38  ;;  %vm2373_vm8 = vcmask 654336   ;;  %vm4328_vm13 = vcmask 785408  }
 0x378   :  { %1793 = vst.msk [vmem:[#allocation3 + $0x328] sm:$0xff] %vm1285_vm5, %v1781_v47 }
 0x37a   :  { %v1805_v60 = vpop.permute.xlu1 %1804 }
 0x37b   :  { %v1867_v37 = vpop.permute.xlu0 %1866  ;;  %v1812_v39 = vsel %vm4324_vm4, %v1803_v34, %v1805_v60  ;;  %v1813_v48 = vsel %vm4325_vm9, %v1805_v60, %v1807_v0  ;;  %vm4329_vm4 = vcmask 261120   ;;  %vm2375_vm9 = vcmask 850944  }
 0x37c   :  { %1825 = vst.msk [vmem:[#allocation3 + $0x358] sm:$0xff] %vm1285_vm5, %v1813_v48  ;;  %v2783_v11 = vpack.c.bf16 %v1812_v39, %v1780_v55 }
 0x37e   :  { %v1833_v21 = vpop.permute.xlu1 %1832 }
 0x37f   :  { %v1839_v44 = vpop.permute.xlu0 %1838  ;;  %v1842_v28 = vsel %vm698_vm14, %v3943_v23, %v1833_v21  ;;  %v1843_v35 = vsel %vm698_vm14, %v1833_v21, %v1835_v2  ;;  %v2041_v61 = vld [vmem:[#allocation3 + $0x328] sm:$0xff]  ;;  %v2741_v23 = vpack.c.bf16 %v3998_v8, %v2063_v20 }
 0x382   :  { %v1865_v54 = vpop.permute.xlu1 %1864 }
 0x383   :  { %v1871_v5 = vpop.permute.xlu0 %1870  ;;  %v1874_v56 = vsel %vm736_vm15, %v3952_v15, %v1865_v54  ;;  %v1875_v13 = vsel %vm736_vm15, %v1865_v54, %v1867_v37  ;;  %v2047_v6 = vld [vmem:[#allocation3 + $0x358] sm:$0xff] }
 0x384   :  { %v2781_v49 = vpack.c.bf16 %v2047_v6, %v2041_v61  ;;  %v2737_v51 = vpack.c.bf16 %v1875_v13, %v1843_v35  ;;  %v2739_v53 = vpack.c.bf16 %v1874_v56, %v1842_v28 }
 0x386   :  { %v1837_v58 = vpop.permute.xlu1 %1836  ;;  %2782 = vmatprep.subr.bf16.mxu0 %v2781_v49  ;;  %2738 = vmatprep.subr.bf16.mxu1 %v2737_v51 }
 0x387   :  { %v1908_v14 = vpop.permute.xlu0 %1907  ;;  %v1844_v7 = vsel %vm698_vm14, %v1835_v2, %v1837_v58  ;;  %v1845_v33 = vsel %vm698_vm14, %v1837_v58, %v1839_v44  ;;  %2784 = vmatpush1.bf16.msra.mxu0 %v2783_v11  ;;  %2740 = vmatpush1.bf16.msra.mxu1 %v2739_v53  ;;  %vm2361_vm14 = vcmask 326656  }
 0x388   :  { %v1909_v15 = vsel %vm97_vm2, %v4048_v19, %v1908_v14  ;;  %1917 = vst.msk [vmem:[#allocation3 + $0x448] sm:$0xff] %vm1285_vm5, %v1908_v14  ;;  %1857 = vst.msk [vmem:[#allocation3 + $0x388] sm:$0xff] %vm1285_vm5, %v1845_v33  ;;  %2742 = vmatprep.subr.bf16.mxu1 %v2741_v23  ;;  %vm2352_vm2 = vcmask 195584  }
 0x38a   :  { %v1869_v46 = vpop.permute.xlu1 %1868 }
 0x38b   :  { %v1930_v42 = vpop.permute.xlu0 %1929  ;;  %v1876_v8 = vsel %vm736_vm15, %v1867_v37, %v1869_v46  ;;  %v1877_v26 = vsel %vm736_vm15, %v1869_v46, %v1871_v5  ;;  %2744 = vmatpush1.bf16.msra.mxu1 %v2743_v24  ;;  %vm2368_vm15 = vcmask 64512  }
 0x38c   :  { %v1931_v45 = vsel %vm39_vm0, %v4050_v25, %v1930_v42  ;;  %1939 = vst.msk [vmem:[#allocation3 + $0x4a8] sm:$0xff] %vm1285_vm5, %v1930_v42  ;;  %1889 = vst.msk [vmem:[#allocation3 + $0x3b8] sm:$0xff] %vm1285_vm5, %v1877_v26  ;;  %2746 = vmatprep.subr.bf16.mxu1 %v4077_v22  ;;  %vm4326_vm0 = vcmask 1022976  }
 0x38e   :  { %v1897_v19 = vpop.permute.xlu1 %1896 }
 0x38f   :  { %v1898_v4 = vsel %vm62_vm1, %v3991_v52, %v1897_v19  ;;  %1906 = vst.msk [vmem:[#allocation3 + $0x418] sm:$0xff] %vm1285_vm5, %v1897_v19  ;;  %2748 = vmatpush1.bf16.msra.mxu1 %v4030_v27  ;;  %v2053_v50 = vld [vmem:[#allocation3 + $0x388] sm:$0xff]  ;;  %v2787_v52 = vpack.c.bf16 %v1876_v8, %v1844_v7  ;;  %vm2359_vm1 = vcmask 130048  }
 0x390   :  { %2209 = vmatprep.subr.mxu1 %v4058_v36  ;;  %v2064_v36 = vld [vmem:[#allocation3 + $0x3e0] sm:$0xff]  ;;  %v2077_v30 = vld [vmem:[#allocation3 + $0x448] sm:$0xff] }
 0x391   :  { %v2791_v43 = vpack.c.bf16 %v1898_v4, %v2064_v36 }
 0x392   :  { %v1919_v34 = vpop.permute.xlu1 %1918 }
 0x393   :  { %v1920_v25 = vsel %vm4326_vm0, %v4007_v10, %v1919_v34  ;;  %1928 = vst.msk [vmem:[#allocation3 + $0x478] sm:$0xff] %vm1285_vm5, %v1919_v34  ;;  %v2059_v3 = vld [vmem:[#allocation3 + $0x3b8] sm:$0xff]  ;;  %2210 = vmatpush1.msra.mxu1 %v4040_v1  ;;  %v2089_v1 = vld [vmem:[#allocation3 + $0x4a8] sm:$0xff]  ;;  %vm4330_vm0 = vmmov %vm4327_vm12 }
 0x394   :  { %v2785_v22 = vpack.c.bf16 %v2059_v3, %v2053_v50  ;;  %2226 = vmatmul.mubr.f32.vlgmr.msra.gmra.mrb[4].mxu1 %v4035_v29  ;;  %v2795_v0 = vpack.c.bf16 %v1920_v25, %v1909_v15 }
 0x396   :  { %2786 = vmatprep.subr.bf16.mxu0 %v2785_v22  ;;  %v2071_v18 = vld [vmem:[#allocation3 + $0x418] sm:$0xff] }
 0x397   :  { %2788 = vmatpush1.bf16.msra.mxu0 %v2787_v52  ;;  %v2789_v27 = vpack.c.bf16 %v2071_v18, %v2065_v57 }
 0x399   :  { %2790 = vmatprep.subr.bf16.mxu0 %v2789_v27 }
 0x39a   :  { %v2083_v10 = vld [vmem:[#allocation3 + $0x478] sm:$0xff] }
 0x39b   :  { %2792 = vmatpush1.bf16.msra.mxu0 %v2791_v43  ;;  %v2793_v16 = vpack.c.bf16 %v2083_v10, %v2077_v30 }
 0x39d   :  { %2794 = vmatprep.subr.bf16.mxu0 %v2793_v16 }
 0x39f   :  { %2796 = vmatpush1.bf16.msra.mxu0 %v2795_v0 }
 0x3a0   :  { %2280 = vmatprep.subr.mxu0 %v2089_v1 }
 0x3a3   :  { %2281 = vmatpush1.msra.mxu0 %v1931_v45 }
 0x3a4   :  { %2297 = vmatmul.mubr.f32.vlgmr.msra.gmra.mrb[6].mxu0 %v4035_v29 }
 0x3df   :  { %v2156_v9 = vpop.f32.mrb[4].mxu0 }
 0x3e0   :  { %v4188_v31 = vadd.f32 %v2156_v9, %v3592_v63  ;;  %v2158_v59 = vpop.f32.mrb[5].mxu0 }
 0x3e1   :  { %v2159_v32 = vadd.f32 %v2158_v59, %v3592_v63 }
 0x3e2   :  { %2307 = vrot.lane.b32.xlu0 %v4188_v31, %s2860_s1  ;;  %2304 = vrot.lane.b32.xlu1 %v4188_v31, %s2861_s24 }
 0x3e6   :  { %2310 = vrot.lane.b32.xlu0 %v4188_v31, %s2862_s29  ;;  %2320 = vrot.lane.b32.xlu1 %v2159_v32, %s2863_s30 }
 0x3ea   :  { %2317 = vrot.lane.b32.xlu0 %v2159_v32, %s2864_s6  ;;  %2323 = vrot.lane.b32.xlu1 %v2159_v32, %s2865_s14 }
 0x3ee   :  { %2314 = vrot.lane.b32.xlu0 %v2159_v32, %s2842_s7 }
 0x454   :  { %v2308_v47 = vpop.permute.xlu0 %2307  ;;  %v2305_v60 = vpop.permute.xlu1 %2304 }
 0x455   :  { %v2353_v49 = vsel %vm2352_vm2, %v4188_v31, %v2305_v60 }
 0x456   :  { %v2355_v14 = vsel %vm2354_vm3, %v2353_v49, %v2308_v47 }
 0x458   :  { %v2311_v37 = vpop.permute.xlu0 %2310  ;;  %v2321_v39 = vpop.permute.xlu1 %2320 }
 0x459   :  { %v2356_v7 = vsel %vm4327_vm12, %v2355_v14, %v2311_v37  ;;  %v23_v37 = vld [vmem:[%s4256_s3] sm:$0xff] }
 0x45c   :  { %v2318_v48 = vpop.permute.xlu0 %2317  ;;  %v2324_v21 = vpop.permute.xlu1 %2323 }
 0x45d   :  { %v2360_v13 = vsel %vm2359_vm1, %v2318_v48, %v2321_v39 }
 0x45e   :  { %v2362_v51 = vsel %vm2361_vm14, %v2360_v13, %v2324_v21  ;;  %v24_v21 = vld [vmem:[%s4257_s4] sm:$0xff] }
 0x460   :  { %v2315_v28 = vpop.permute.xlu0 %2314 }
 0x461   :  { %v2357_v33 = vsel %vm4328_vm13, %v2356_v7, %v2315_v28 }
 0x462   :  { %v2358_v4 = vsel %vm1285_vm5, %v2357_v33, %v2318_v48 }
 0x463   :  { %v2415_v22 = vmul.f32 %v2358_v4, %v2358_v4 }
 0x467   :  { %v2227_v29 = vpop.f32.mrb[4].mxu1 }
 0x468   :  { %v2228_v62 = vadd.f32 %v2227_v29, %v3592_v63  ;;  %v2229_v41 = vpop.f32.mrb[5].mxu1 }
 0x469   :  { %v2230_v38 = vadd.f32 %v2229_v41, %v3592_v63 }
 0x46a   :  { %2333 = vrot.lane.b32.xlu0 %v2228_v62, %s2866_s15  ;;  %2327 = vrot.lane.b32.xlu1 %v2228_v62, %s2847_s16  ;;  %s2871_s16 = smov 8  }
 0x46e   :  { %2340 = vrot.lane.b32.xlu0 %v2230_v38, %s2852_s22  ;;  %2336 = vrot.lane.b32.xlu1 %v2228_v62, %s2867_s17 }
 0x472   :  { %2330 = vrot.lane.b32.xlu1 %v2228_v62, %s2868_s0 }
 0x476   :  { %2343 = vrot.lane.b32.xlu1 %v2230_v38, %s2869_s20 }
 0x477   :  { %v2298_v40 = vpop.f32.mrb[6].mxu0 }
 0x478   :  { %v2299_v17 = vadd.f32 %v2298_v40, %v3592_v63  ;;  %v2300_v2 = vpop.f32.mrb[7].mxu0 }
 0x479   :  { %v2301_v55 = vadd.f32 %v2300_v2, %v3592_v63 }
 0x47a   :  { %2378 = vrot.lane.b32.xlu0 %v2299_v17, %s2861_s24  ;;  %2346 = vrot.lane.b32.xlu1 %v2230_v38, %s2870_s21 }
 0x47e   :  { %2381 = vrot.lane.b32.xlu0 %v2299_v17, %s2860_s1  ;;  %2349 = vrot.lane.b32.xlu1 %v2230_v38, %s2871_s16 }
 0x482   :  { %2384 = vrot.lane.b32.xlu0 %v2299_v17, %s2862_s29  ;;  %2388 = vrot.lane.b32.xlu1 %v2301_v55, %s2842_s7 }
 0x486   :  { %2391 = vrot.lane.b32.xlu0 %v2301_v55, %s2864_s6  ;;  %2394 = vrot.lane.b32.xlu1 %v2301_v55, %s2863_s30 }
 0x48a   :  { %2397 = vrot.lane.b32.xlu0 %v2301_v55, %s2865_s14 }
 0x4dc   :  { %v2328_v44 = vpop.permute.xlu1 %2327  ;;  %v2334_v63 = vpop.permute.xlu0 %2333 }
 0x4dd   :  { %v2363_v53 = vsel %vm394_vm10, %v2362_v51, %v2328_v44 }
 0x4e0   :  { %v2337_v35 = vpop.permute.xlu1 %2336  ;;  %v2341_v5 = vpop.permute.xlu0 %2340 }
 0x4e1   :  { %v2369_v11 = vsel %vm2368_vm15, %v2334_v63, %v2337_v35  ;;  %vm4331_vm15 = vmmov %vm4328_vm13 }
 0x4e2   :  { %v2370_v12 = vsel %vm4329_vm4, %v2369_v11, %v2341_v5 }
 0x4e4   :  { %v2331_v54 = vpop.permute.xlu1 %2330 }
 0x4e5   :  { %v2365_v23 = vsel %vm2364_vm6, %v2363_v53, %v2331_v54 }
 0x4e6   :  { %v2367_v24 = vsel %vm2366_vm11, %v2365_v23, %v2334_v63 }
 0x4e7   :  { %v2416_v25 = vmul.f32 %v2367_v24, %v2367_v24  ;;  %v2407_v52 = vadd.f32 %v2367_v24, %v2358_v4 }
 0x4e8   :  { %v2344_v56 = vpop.permute.xlu1 %2343 }
 0x4e9   :  { %v2372_v42 = vsel %vm2371_vm7, %v2370_v12, %v2344_v56  ;;  %v2420_v36 = vadd.f32 %v2416_v25, %v2415_v22 }
 0x4ec   :  { %v2379_v61 = vpop.permute.xlu0 %2378  ;;  %v2347_v6 = vpop.permute.xlu1 %2346 }
 0x4ed   :  { %v2400_v15 = vsel %vm2352_vm2, %v2299_v17, %v2379_v61  ;;  %v2374_v19 = vsel %vm2373_vm8, %v2372_v42, %v2347_v6 }
 0x4f0   :  { %v2382_v20 = vpop.permute.xlu0 %2381  ;;  %v2350_v58 = vpop.permute.xlu1 %2349 }
 0x4f1   :  { %v2401_v46 = vsel %vm2354_vm3, %v2400_v15, %v2382_v20  ;;  %v2376_v34 = vsel %vm2375_vm9, %v2374_v19, %v2350_v58 }
 0x4f2   :  { %v2417_v57 = vmul.f32 %v2376_v34, %v2376_v34  ;;  %v2408_v43 = vadd.f32 %v2407_v52, %v2376_v34 }
 0x4f4   :  { %v2385_v8 = vpop.permute.xlu0 %2384  ;;  %v2389_v26 = vpop.permute.xlu1 %2388  ;;  %v2421_v0 = vadd.f32 %v2420_v36, %v2417_v57 }
 0x4f5   :  { %v2402_v45 = vsel %vm4330_vm0, %v2401_v46, %v2385_v8 }
 0x4f6   :  { %v2403_v3 = vsel %vm4331_vm15, %v2402_v45, %v2389_v26 }
 0x4f8   :  { %v2392_v50 = vpop.permute.xlu0 %2391  ;;  %v2395_v27 = vpop.permute.xlu1 %2394 }
 0x4f9   :  { %v2404_v18 = vsel %vm1285_vm5, %v2403_v3, %v2392_v50  ;;  %v2405_v16 = vsel %vm2359_vm1, %v2392_v50, %v2395_v27 }
 0x4fa   :  { %v2418_v30 = vmul.f32 %v2404_v18, %v2404_v18  ;;  %v2409_v9 = vadd.f32 %v2408_v43, %v2404_v18 }
 0x4fc   :  { %v2398_v10 = vpop.permute.xlu0 %2397  ;;  %v2422_v29 = vadd.f32 %v2421_v0, %v2418_v30 }
 0x4fd   :  { %v2406_v1 = vsel %vm2361_vm14, %v2405_v16, %v2398_v10 }
 0x4fe   :  { %v2419_v31 = vmul.f32 %v2406_v1, %v2406_v1  ;;  %v2410_v59 = vsel %vm394_vm10, %v2406_v1, 0.0 }
 0x4ff   :  { %v2411_v32 = vadd.f32 %v2410_v59, %v2409_v9 }
 0x500   :  { %v2423_v62 = vsel %vm394_vm10, %v2419_v31, 0.0 }
 0x501   :  { %2412 = vadd.xlane.f32.xlu1 %v2411_v32  ;;  %v2424_v41 = vadd.f32 %v2423_v62, %v2422_v29 }
 0x503   :  { %2425 = vadd.xlane.f32.xlu0 %v2424_v41 }
 0x58e   :  { %v2413_v38 = vpop.xlane.xlu1 %2412 }
 0x58f   :  { %v2428_v40 = vmul.f32 0.0017361111, %v2413_v38 }
 0x590   :  { %v2426_v17 = vpop.xlane.xlu0 %2425 }
 0x591   :  { %v2430_v2 = vmul.f32 %v2428_v40, %v2428_v40  ;;  %v2429_v55 = vmul.f32 0.0017361111, %v2426_v17 }
 0x593   :  { %v2431_v47 = vsub.f32 %v2429_v55, %v2430_v2 }
 0x595   :  { %v2432_v60 = vadd.f32 1e-05, %v2431_v47 }
 0x597   :  { %2833 = vrsqrt.f32 %v2432_v60 }
 0x5a1   :  { %v2834_v39 = vpop.eup %2833 }
 0x5a2   :  { %v2434_v48 = vmul.f32 %v2834_v39, %v23_v37 }
 0x5a4   :  { %2439 = vperm.xlu0 %2831, %v2434_v48   ;;  %v2435_v44 = vmul.f32 %v2434_v48, %v2428_v40 }
 0x5a6   :  { %v2436_v28 = vsub.f32 %v24_v21, %v2435_v44 }
 0x5a8   :  { %2449 = vperm.xlu1 %2832, %v2436_v28  }
 0x623   :  { %v2440_v35 = vpop.permute.xlu0 %2439 }
 0x624   :  { %v2442_v63 = vmul.f32 %v2440_v35, %v2358_v4  ;;  %v2443_v54 = vmul.f32 %v2440_v35, %v2367_v24  ;;  %v2444_v5 = vmul.f32 %v2440_v35, %v2376_v34  ;;  %v2445_v56 = vmul.f32 %v2440_v35, %v2404_v18 }
 0x625   :  { %v2446_v13 = vmul.f32 %v2440_v35, %v2406_v1 }
 0x627   :  { %v2450_v61 = vpop.permute.xlu1 %2449 }
 0x628   :  { %v2452_v6 = vadd.f32 %v2450_v61, %v2442_v63  ;;  %v2453_v49 = vadd.f32 %v2450_v61, %v2443_v54  ;;  %v2454_v51 = vadd.f32 %v2450_v61, %v2444_v5  ;;  %v2455_v53 = vadd.f32 %v2450_v61, %v2445_v56 }
 0x629   :  { %v2456_v11 = vadd.f32 %v2450_v61, %v2446_v13 }
 0x62a   :  { %2457 = vst [vmem:[%s4258_s5] sm:$0xff] %v2452_v6  ;;  %2458 = vst [vmem:[%s4258_s5 + $0x8] sm:$0xff] %v2453_v49 }
 0x62b   :  { %2459 = vst [vmem:[%s4258_s5 + $0x10] sm:$0xff] %v2454_v51  ;;  %2460 = vst [vmem:[%s4258_s5 + $0x18] sm:$0xff] %v2455_v53 }
 0x62c   :  { %2461 = vst.msk [vmem:[%s4258_s5 + $0x20] sm:$0xff] %vm394_vm10, %v2456_v11 }

</bundles_post_ra>
